<compile_context>
chip_gen: v6e
topology: v6e:2x2x1
jax: 0.10.0
libtpu: 0.0.40
codegen_flags: <defaults>
</compile_context>

<pallas_src>
import jax
import jax.numpy as jnp
from jax.experimental import pallas as pl
from jax.experimental.pallas import tpu as pltpu


# ----------------------------------------------------------------------------
# Fused kernel
# ----------------------------------------------------------------------------
def _make_fused_kernel(T: int, B: int, H: int, TG: int):
    H2 = 2 * H  # combined [fwd | bwd] width

    def kernel(x_ref, w_in_ref, b_in_ref, w_hh_ref, mask_ref,
               fc_w_ref, fc_b_ref, perm_ref, o_ref, h_sc):
        # ---- prologue: ONE fused input projection for both directions ------
        # x row (t*B + b) = [x(t, b) | x(T-1-t, b)];  W_in is block structured
        # so fwd columns only see x(t) and bwd columns only see x(T-1-t).
        zx = jnp.dot(x_ref[...], w_in_ref[...],
                     preferred_element_type=jnp.float32) + b_in_ref[...]

        w_hh = w_hh_ref[...]          # (2H, 8H), loop invariant
        msk = mask_ref[...]           # (T*B, 2H) 0/1 validity, loop-order rows

        h = jnp.zeros((B, H2), jnp.float32)   # [h_fwd | h_bwd]
        c = jnp.zeros((B, H2), jnp.float32)   # [c_fwd | c_bwd]

        # ---- merged fwd+bwd recurrence, statically unrolled -----------------
        # step t advances fwd at time t and bwd at time T-1-t simultaneously;
        # one (B,2H)@(2H,8H) MXU op per step replaces the two separate ones.
        for t in range(T):
            z = zx[t * B:(t + 1) * B, :] + jnp.dot(
                h, w_hh, preferred_element_type=jnp.float32)      # (B, 8H)
            # gate columns are interleaved [i_f,i_b,f_f,f_b,g_f,g_b,o_f,o_b];
            # one full-width sigmoid pass, slices for i/f/o; tanh on g only.
            sg = jax.nn.sigmoid(z)
            i_g = sg[:, 0:H2]
            f_g = sg[:, H2:2 * H2]
            o_g = sg[:, 3 * H2:4 * H2]
            g_g = jnp.tanh(z[:, 2 * H2:3 * H2])

            m = msk[t * B:(t + 1) * B, :]                          # (B, 2H)
            # Zeroing (instead of freezing) is sufficient: fwd positions past
            # the length never feed a valid output, and the bwd state must
            # simply stay zero until its sequence starts.
            c = (f_g * c + i_g * g_g) * m
            h = o_g * jnp.tanh(c)      # exactly 0 wherever m == 0

            # time-aligned writes into the shared hidden scratch:
            # fwd half belongs to time t, bwd half to time T-1-t.
            h_sc[t * B:(t + 1) * B, 0:H] = h[:, 0:H]
            h_sc[(T - 1 - t) * B:(T - t) * B, H:H2] = h[:, H:H2]

        # ---- epilogue: batch-first reorder + FC + log_softmax ---------------
        # Exact 0/1 permutation matmul: row (b*T + t) <- row (t*B + b).
        hidden_bm = jnp.dot(perm_ref[...], h_sc[...],
                            preferred_element_type=jnp.float32)   # (B*T, 2H)
        logits = jnp.dot(hidden_bm, fc_w_ref[...],
                         preferred_element_type=jnp.float32) + fc_b_ref[...]
        mx = jnp.max(logits, axis=-1, keepdims=True)
        zs = logits - mx
        lse = jnp.log(jnp.sum(jnp.exp(zs), axis=-1, keepdims=True))
        o_ref[...] = (zs - lse).reshape(B, T, TG)                  # batch-first

    return kernel


def fused_bilstm_pos(x_cat, mask, perm, w_in, b_in, w_hh, fc_w, fc_b,
                     *, T, B, H, TG):
    """All operands pre-packed 2-D. Returns (B, T, TG) log-probs."""
    vmem = pl.BlockSpec(memory_space=pltpu.MemorySpace.VMEM)
    return pl.pallas_call(
        _make_fused_kernel(T, B, H, TG),
        out_shape=jax.ShapeDtypeStruct((B, T, TG), jnp.float32),
        in_specs=[vmem] * 8,
        out_specs=vmem,
        scratch_shapes=[pltpu.VMEM((T * B, 2 * H), jnp.float32)],
    )(x_cat, w_in, b_in, w_hh, mask, fc_w, fc_b, perm)


# ----------------------------------------------------------------------------
# Parameter packing (done once, outside the jitted forward)
# ----------------------------------------------------------------------------
def pack_params(params):
    """Per-direction PyTorch-layout weights -> fused kernel layout."""
    H = params["w_hh_f"].shape[0]

    def gate_interleave(a, b):
        # (..., 4H) x2 -> (..., 8H) with columns [i_f,i_b,f_f,f_b,g_f,g_b,o_f,o_b]
        lead = a.shape[:-1]
        a4 = a.reshape(lead + (4, H))
        b4 = b.reshape(lead + (4, H))
        return jnp.concatenate([a4, b4], axis=-1).reshape(lead + (8 * H,))

    zf_ih = jnp.zeros_like(params["w_ih_f"])
    zb_ih = jnp.zeros_like(params["w_ih_b"])
    zf_hh = jnp.zeros_like(params["w_hh_f"])
    zb_hh = jnp.zeros_like(params["w_hh_b"])

    w_in_big = jnp.concatenate(
        [gate_interleave(params["w_ih_f"], zf_ih),     # rows 0:E  (x at t)
         gate_interleave(zb_ih, params["w_ih_b"])],    # rows E:2E (x at T-1-t)
        axis=0)                                        # (2E, 8H)
    w_hh_big = jnp.concatenate(
        [gate_interleave(params["w_hh_f"], zf_hh),     # rows 0:H  (h_fwd)
         gate_interleave(zb_hh, params["w_hh_b"])],    # rows H:2H (h_bwd)
        axis=0)                                        # (2H, 8H)
    b_in_big = gate_interleave(params["b_f"], params["b_b"])  # (1, 8H)

    return {"embedding": params["embedding"],
            "w_in_big": w_in_big, "b_in_big": b_in_big, "w_hh_big": w_hh_big,
            "fc_w": params["fc_w"], "fc_b": params["fc_b"]}


# ----------------------------------------------------------------------------
# Full forward pass (embedding gather + tiny metadata prep in plain JAX,
# everything else in the single fused Pallas kernel).
# ----------------------------------------------------------------------------
@jax.jit
def bilstm_pos_forward(packed, x_tokens, lengths):
    """x_tokens: (B, T) int32, lengths: (B,) int32.  Returns (B, T, TG)."""
    B, T = x_tokens.shape
    E = packed["embedding"].shape[1]
    H = packed["w_hh_big"].shape[0] // 2
    TG = packed["fc_w"].shape[1]

    # Embedding lookup directly in time-major order (folds the batch->time
    # transpose into the gather: no separate XLA transpose op).
    emb = packed["embedding"][x_tokens.T]                       # (T, B, E)
    # max_norm=True: rescale gathered rows whose L2 norm exceeds 1.
    norms = jnp.sqrt(jnp.sum(emb * emb, axis=-1, keepdims=True))
    emb = (emb * jnp.where(norms > 1.0, 1.0 / (norms + 1e-7), 1.0)
           ).astype(jnp.float32)

    x_fwd = emb.reshape(T * B, E)                               # row t*B+b = x(t,b)
    x_bwd = emb[::-1].reshape(T * B, E)                         # row t*B+b = x(T-1-t,b)
    x_cat = jnp.concatenate([x_fwd, x_bwd], axis=-1)            # (T*B, 2E)

    # Packed-sequence validity mask in loop order (replaces the lens input):
    # fwd half valid iff t < len, bwd half valid iff (T-1-t) < len.
    lens = lengths.astype(jnp.int32)
    t_idx = jnp.arange(T, dtype=jnp.int32)[:, None]             # (T, 1)
    vf = (t_idx < lens[None, :]).astype(jnp.float32)            # (T, B)
    vb = ((T - 1 - t_idx) < lens[None, :]).astype(jnp.float32)  # (T, B)
    mask = jnp.concatenate(
        [jnp.broadcast_to(vf[:, :, None], (T, B, H)),
         jnp.broadcast_to(vb[:, :, None], (T, B, H))],
        axis=-1).reshape(T * B, 2 * H)

    # Constant (time-major -> batch-major) row permutation matrix, folded at
    # compile time; applied inside the kernel with one tiny exact MXU matmul.
    r = jnp.arange(B * T, dtype=jnp.int32)
    s = jnp.arange(T * B, dtype=jnp.int32)
    perm = ((r[:, None] // T == s[None, :] % B) &
            (r[:, None] % T == s[None, :] // B)).astype(jnp.float32)

    return fused_bilstm_pos(
        x_cat, mask, perm,
        packed["w_in_big"], packed["b_in_big"], packed["w_hh_big"],
        packed["fc_w"], packed["fc_b"],
        T=T, B=B, H=H, TG=TG)


# ----------------------------------------------------------------------------
# Pure-JAX reference (per-direction, PyTorch gate order) used to validate the
# block-diagonal / interleaved weight packing and the masking.
# ----------------------------------------------------------------------------
@jax.jit
def reference_forward(params, x_tokens, lengths):
    hi = jax.lax.Precision.HIGHEST
    emb = params["embedding"][x_tokens]                         # (B, T, E)
    norms = jnp.sqrt(jnp.sum(emb * emb, axis=-1, keepdims=True))
    emb = (emb * jnp.where(norms > 1.0, 1.0 / (norms + 1e-7), 1.0)
           ).astype(jnp.float32)
    B, T, _ = emb.shape
    H = params["w_hh_f"].shape[0]
    lens = lengths.astype(jnp.int32)

    def run(w_ih, w_hh, b, reverse):
        h = jnp.zeros((B, H), jnp.float32)
        c = jnp.zeros((B, H), jnp.float32)
        outs = [None] * T
        order = range(T - 1, -1, -1) if reverse else range(T)
        for t in order:
            z = (jnp.dot(emb[:, t, :], w_ih, precision=hi)
                 + jnp.dot(h, w_hh, precision=hi) + b)
            i = jax.nn.sigmoid(z[:, 0:H])
            f = jax.nn.sigmoid(z[:, H:2 * H])
            g = jnp.tanh(z[:, 2 * H:3 * H])
            o = jax.nn.sigmoid(z[:, 3 * H:4 * H])
            valid = (t < lens)[:, None]
            c = jnp.where(valid, f * c + i * g, 0.0)
            h = jnp.where(valid, o * jnp.tanh(c), 0.0)
            outs[t] = h
        return jnp.stack(outs, axis=1)                          # (B, T, H)

    hf = run(params["w_ih_f"], params["w_hh_f"], params["b_f"], False)
    hb = run(params["w_ih_b"], params["w_hh_b"], params["b_b"], True)
    hid = jnp.concatenate([hf, hb], axis=-1)                    # (B, T, 2H)
    logits = jnp.dot(hid, params["fc_w"], precision=hi) + params["fc_b"]
    return jax.nn.log_softmax(logits, axis=-1)


def init_params(key, vocab_size, tag_size, embedding_dim, hidden_dim):
    ks = jax.random.split(key, 12)
    E, H, Tg = embedding_dim, hidden_dim, tag_size
    k_lstm = 1.0 / jnp.sqrt(jnp.float32(H))
    k_fc = 1.0 / jnp.sqrt(jnp.float32(2 * H))
    u = lambda k, shape, bound: jax.random.uniform(
        k, shape, jnp.float32, minval=-bound, maxval=bound)
    return {
        "embedding": jax.random.normal(ks[0], (vocab_size, E), jnp.float32),
        # forward direction (stored transposed for x @ W; gate order i,f,g,o)
        "w_ih_f": u(ks[1], (E, 4 * H), k_lstm),
        "w_hh_f": u(ks[2], (H, 4 * H), k_lstm),
        "b_f": u(ks[3], (1, 4 * H), k_lstm) + u(ks[4], (1, 4 * H), k_lstm),
        # backward direction
        "w_ih_b": u(ks[5], (E, 4 * H), k_lstm),
        "w_hh_b": u(ks[6], (H, 4 * H), k_lstm),
        "b_b": u(ks[7], (1, 4 * H), k_lstm) + u(ks[8], (1, 4 * H), k_lstm),
        # classifier
        "fc_w": u(ks[9], (2 * H, Tg), k_fc),
        "fc_b": u(ks[10], (1, Tg), k_fc),
    }


if __name__ == "__main__":
    VOCAB, TAGS, EMB, HID = 50, 10, 32, 32
    B, T = 4, 8

    key = jax.random.PRNGKey(0)
    k_param, k_tok = jax.random.split(key)

    params = init_params(k_param, VOCAB, TAGS, EMB, HID)
    packed = pack_params(params)
    x_tokens = jax.random.randint(k_tok, (B, T), 0, VOCAB, dtype=jnp.int32)
    lengths = jnp.array([8, 6, 5, 3], dtype=jnp.int32)   # max length == T

    out = bilstm_pos_forward(packed, x_tokens, lengths)
    jax.block_until_ready(out)
    assert out.shape == (B, T, TAGS), out.shape

    # log_softmax sanity: probabilities sum to 1 along the tag axis.
    sums = jnp.sum(jnp.exp(out), axis=-1)
    assert bool(jnp.all(jnp.isfinite(out))), "non-finite outputs"
    assert bool(jnp.all(jnp.abs(sums - 1.0) < 1e-4)), "log_softmax not normalized"

    # validate the merged/interleaved-weight recurrence against a pure-JAX
    # per-direction reference (loose tol: MXU vs XLA matmul / EUP rounding).
    ref = reference_forward(params, x_tokens, lengths)
    jax.block_until_ready(ref)
    max_diff = float(jnp.max(jnp.abs(out - ref)))
    assert max_diff < 5e-2, f"kernel/reference mismatch: {max_diff}"

    print("KERNEL_OK")
</pallas_src>

<mosaic_0001>
module attributes {stable_mosaic.version = 11 : i64} {
  func.func @kernel(%arg0: memref<32x64xf32, #tpu.memory_space<vmem>>, %arg1: memref<64x256xf32, #tpu.memory_space<vmem>>, %arg2: memref<1x256xf32, #tpu.memory_space<vmem>>, %arg3: memref<64x256xf32, #tpu.memory_space<vmem>>, %arg4: memref<32x64xf32, #tpu.memory_space<vmem>>, %arg5: memref<64x10xf32, #tpu.memory_space<vmem>>, %arg6: memref<1x10xf32, #tpu.memory_space<vmem>>, %arg7: memref<32x32xf32, #tpu.memory_space<vmem>>, %arg8: memref<4x8x10xf32, #tpu.memory_space<vmem>>, %arg9: memref<32x64xf32, #tpu.memory_space<vmem>>) attributes {dimension_semantics = [], scalar_prefetch = 0 : i64, scratch_operands = 1 : i64, tpu.core_type = #tpu.core_type<tc>} {
    %c0 = arith.constant 0 : index
    %c0_0 = arith.constant 0 : index
    %0 = vector.load %arg0[%c0, %c0_0] : memref<32x64xf32, #tpu.memory_space<vmem>>, vector<32x64xf32>
    %c0_1 = arith.constant 0 : index
    %c0_2 = arith.constant 0 : index
    %1 = vector.load %arg1[%c0_1, %c0_2] : memref<64x256xf32, #tpu.memory_space<vmem>>, vector<64x256xf32>
    %cst = arith.constant dense<0.000000e+00> : vector<32x256xf32>
    %2 = tpu.matmul %0, %1, %cst {dimension_numbers = #tpu.dot_dimension_numbers<[1], [0], [0], [1], [0, 0, 1, 1], [], []>} : vector<32x64xf32>, vector<64x256xf32>, vector<32x256xf32> -> vector<32x256xf32>
    %c0_3 = arith.constant 0 : index
    %c0_4 = arith.constant 0 : index
    %3 = vector.load %arg2[%c0_3, %c0_4] : memref<1x256xf32, #tpu.memory_space<vmem>>, vector<1x256xf32>
    %4 = vector.broadcast %3 : vector<1x256xf32> to vector<32x256xf32>
    %5 = arith.addf %2, %4 : vector<32x256xf32>
    %c0_5 = arith.constant 0 : index
    %c0_6 = arith.constant 0 : index
    %6 = vector.load %arg3[%c0_5, %c0_6] : memref<64x256xf32, #tpu.memory_space<vmem>>, vector<64x256xf32>
    %c0_7 = arith.constant 0 : index
    %c0_8 = arith.constant 0 : index
    %7 = vector.load %arg4[%c0_7, %c0_8] : memref<32x64xf32, #tpu.memory_space<vmem>>, vector<32x64xf32>
    %cst_9 = arith.constant 0.000000e+00 : f32
    %8 = vector.broadcast %cst_9 : f32 to vector<4x64xf32>
    %cst_10 = arith.constant 0.000000e+00 : f32
    %9 = vector.broadcast %cst_10 : f32 to vector<4x64xf32>
    %10 = vector.extract_strided_slice %5 {offsets = [0, 0], sizes = [4, 256], strides = [1, 1]} : vector<32x256xf32> to vector<4x256xf32>
    %cst_11 = arith.constant dense<0.000000e+00> : vector<4x256xf32>
    %11 = tpu.matmul %8, %6, %cst_11 {dimension_numbers = #tpu.dot_dimension_numbers<[1], [0], [0], [1], [0, 0, 1, 1], [], []>} : vector<4x64xf32>, vector<64x256xf32>, vector<4x256xf32> -> vector<4x256xf32>
    %12 = arith.addf %10, %11 : vector<4x256xf32>
    %13 = arith.negf %12 : vector<4x256xf32>
    %14 = math.exp %13 : vector<4x256xf32>
    %cst_12 = arith.constant 1.000000e+00 : f32
    %15 = vector.broadcast %cst_12 : f32 to vector<4x256xf32>
    %16 = arith.addf %15, %14 : vector<4x256xf32>
    %17 = arith.divf %15, %16 : vector<4x256xf32>
    %18 = vector.extract_strided_slice %17 {offsets = [0, 0], sizes = [4, 64], strides = [1, 1]} : vector<4x256xf32> to vector<4x64xf32>
    %19 = vector.extract_strided_slice %17 {offsets = [0, 64], sizes = [4, 64], strides = [1, 1]} : vector<4x256xf32> to vector<4x64xf32>
    %20 = vector.extract_strided_slice %17 {offsets = [0, 192], sizes = [4, 64], strides = [1, 1]} : vector<4x256xf32> to vector<4x64xf32>
    %21 = vector.extract_strided_slice %12 {offsets = [0, 128], sizes = [4, 64], strides = [1, 1]} : vector<4x256xf32> to vector<4x64xf32>
    %22 = math.tanh %21 : vector<4x64xf32>
    %23 = vector.extract_strided_slice %7 {offsets = [0, 0], sizes = [4, 64], strides = [1, 1]} : vector<32x64xf32> to vector<4x64xf32>
    %24 = arith.mulf %19, %9 : vector<4x64xf32>
    %25 = arith.mulf %18, %22 : vector<4x64xf32>
    %26 = arith.addf %24, %25 : vector<4x64xf32>
    %27 = arith.mulf %26, %23 : vector<4x64xf32>
    %28 = math.tanh %27 : vector<4x64xf32>
    %29 = arith.mulf %20, %28 : vector<4x64xf32>
    %30 = vector.extract_strided_slice %29 {offsets = [0, 0], sizes = [4, 32], strides = [1, 1]} : vector<4x64xf32> to vector<4x32xf32>
    %c0_13 = arith.constant 0 : index
    %c0_14 = arith.constant 0 : index
    %31 = vector.load %arg9[%c0_13, %c0_14] : memref<32x64xf32, #tpu.memory_space<vmem>>, vector<4x32xf32>
    tpu.vector_store %arg9[%c0_13, %c0_14], %30 {strides = array<i32>} : memref<32x64xf32, #tpu.memory_space<vmem>>, vector<4x32xf32>,
    %32 = vector.extract_strided_slice %29 {offsets = [0, 32], sizes = [4, 32], strides = [1, 1]} : vector<4x64xf32> to vector<4x32xf32>
    %c28 = arith.constant 28 : index
    %c32 = arith.constant 32 : index
    %33 = vector.load %arg9[%c28, %c32] : memref<32x64xf32, #tpu.memory_space<vmem>>, vector<4x32xf32>
    tpu.vector_store %arg9[%c28, %c32], %32 {strides = array<i32>} : memref<32x64xf32, #tpu.memory_space<vmem>>, vector<4x32xf32>,
    %34 = vector.extract_strided_slice %5 {offsets = [4, 0], sizes = [4, 256], strides = [1, 1]} : vector<32x256xf32> to vector<4x256xf32>
    %cst_15 = arith.constant dense<0.000000e+00> : vector<4x256xf32>
    %35 = tpu.matmul %29, %6, %cst_15 {dimension_numbers = #tpu.dot_dimension_numbers<[1], [0], [0], [1], [0, 0, 1, 1], [], []>} : vector<4x64xf32>, vector<64x256xf32>, vector<4x256xf32> -> vector<4x256xf32>
    %36 = arith.addf %34, %35 : vector<4x256xf32>
    %37 = arith.negf %36 : vector<4x256xf32>
    %38 = math.exp %37 : vector<4x256xf32>
    %cst_16 = arith.constant 1.000000e+00 : f32
    %39 = vector.broadcast %cst_16 : f32 to vector<4x256xf32>
    %40 = arith.addf %39, %38 : vector<4x256xf32>
    %41 = arith.divf %39, %40 : vector<4x256xf32>
    %42 = vector.extract_strided_slice %41 {offsets = [0, 0], sizes = [4, 64], strides = [1, 1]} : vector<4x256xf32> to vector<4x64xf32>
    %43 = vector.extract_strided_slice %41 {offsets = [0, 64], sizes = [4, 64], strides = [1, 1]} : vector<4x256xf32> to vector<4x64xf32>
    %44 = vector.extract_strided_slice %41 {offsets = [0, 192], sizes = [4, 64], strides = [1, 1]} : vector<4x256xf32> to vector<4x64xf32>
    %45 = vector.extract_strided_slice %36 {offsets = [0, 128], sizes = [4, 64], strides = [1, 1]} : vector<4x256xf32> to vector<4x64xf32>
    %46 = math.tanh %45 : vector<4x64xf32>
    %47 = vector.extract_strided_slice %7 {offsets = [4, 0], sizes = [4, 64], strides = [1, 1]} : vector<32x64xf32> to vector<4x64xf32>
    %48 = arith.mulf %43, %27 : vector<4x64xf32>
    %49 = arith.mulf %42, %46 : vector<4x64xf32>
    %50 = arith.addf %48, %49 : vector<4x64xf32>
    %51 = arith.mulf %50, %47 : vector<4x64xf32>
    %52 = math.tanh %51 : vector<4x64xf32>
    %53 = arith.mulf %44, %52 : vector<4x64xf32>
    %54 = vector.extract_strided_slice %53 {offsets = [0, 0], sizes = [4, 32], strides = [1, 1]} : vector<4x64xf32> to vector<4x32xf32>
    %c4 = arith.constant 4 : index
    %c0_17 = arith.constant 0 : index
    %55 = vector.load %arg9[%c4, %c0_17] : memref<32x64xf32, #tpu.memory_space<vmem>>, vector<4x32xf32>
    tpu.vector_store %arg9[%c4, %c0_17], %54 {strides = array<i32>} : memref<32x64xf32, #tpu.memory_space<vmem>>, vector<4x32xf32>,
    %56 = vector.extract_strided_slice %53 {offsets = [0, 32], sizes = [4, 32], strides = [1, 1]} : vector<4x64xf32> to vector<4x32xf32>
    %c24 = arith.constant 24 : index
    %c32_18 = arith.constant 32 : index
    %57 = vector.load %arg9[%c24, %c32_18] : memref<32x64xf32, #tpu.memory_space<vmem>>, vector<4x32xf32>
    tpu.vector_store %arg9[%c24, %c32_18], %56 {strides = array<i32>} : memref<32x64xf32, #tpu.memory_space<vmem>>, vector<4x32xf32>,
    %58 = vector.extract_strided_slice %5 {offsets = [8, 0], sizes = [4, 256], strides = [1, 1]} : vector<32x256xf32> to vector<4x256xf32>
    %cst_19 = arith.constant dense<0.000000e+00> : vector<4x256xf32>
    %59 = tpu.matmul %53, %6, %cst_19 {dimension_numbers = #tpu.dot_dimension_numbers<[1], [0], [0], [1], [0, 0, 1, 1], [], []>} : vector<4x64xf32>, vector<64x256xf32>, vector<4x256xf32> -> vector<4x256xf32>
    %60 = arith.addf %58, %59 : vector<4x256xf32>
    %61 = arith.negf %60 : vector<4x256xf32>
    %62 = math.exp %61 : vector<4x256xf32>
    %cst_20 = arith.constant 1.000000e+00 : f32
    %63 = vector.broadcast %cst_20 : f32 to vector<4x256xf32>
    %64 = arith.addf %63, %62 : vector<4x256xf32>
    %65 = arith.divf %63, %64 : vector<4x256xf32>
    %66 = vector.extract_strided_slice %65 {offsets = [0, 0], sizes = [4, 64], strides = [1, 1]} : vector<4x256xf32> to vector<4x64xf32>
    %67 = vector.extract_strided_slice %65 {offsets = [0, 64], sizes = [4, 64], strides = [1, 1]} : vector<4x256xf32> to vector<4x64xf32>
    %68 = vector.extract_strided_slice %65 {offsets = [0, 192], sizes = [4, 64], strides = [1, 1]} : vector<4x256xf32> to vector<4x64xf32>
    %69 = vector.extract_strided_slice %60 {offsets = [0, 128], sizes = [4, 64], strides = [1, 1]} : vector<4x256xf32> to vector<4x64xf32>
    %70 = math.tanh %69 : vector<4x64xf32>
    %71 = vector.extract_strided_slice %7 {offsets = [8, 0], sizes = [4, 64], strides = [1, 1]} : vector<32x64xf32> to vector<4x64xf32>
    %72 = arith.mulf %67, %51 : vector<4x64xf32>
    %73 = arith.mulf %66, %70 : vector<4x64xf32>
    %74 = arith.addf %72, %73 : vector<4x64xf32>
    %75 = arith.mulf %74, %71 : vector<4x64xf32>
    %76 = math.tanh %75 : vector<4x64xf32>
    %77 = arith.mulf %68, %76 : vector<4x64xf32>
    %78 = vector.extract_strided_slice %77 {offsets = [0, 0], sizes = [4, 32], strides = [1, 1]} : vector<4x64xf32> to vector<4x32xf32>
    %c8 = arith.constant 8 : index
    %c0_21 = arith.constant 0 : index
    %79 = vector.load %arg9[%c8, %c0_21] : memref<32x64xf32, #tpu.memory_space<vmem>>, vector<4x32xf32>
    tpu.vector_store %arg9[%c8, %c0_21], %78 {strides = array<i32>} : memref<32x64xf32, #tpu.memory_space<vmem>>, vector<4x32xf32>,
    %80 = vector.extract_strided_slice %77 {offsets = [0, 32], sizes = [4, 32], strides = [1, 1]} : vector<4x64xf32> to vector<4x32xf32>
    %c20 = arith.constant 20 : index
    %c32_22 = arith.constant 32 : index
    %81 = vector.load %arg9[%c20, %c32_22] : memref<32x64xf32, #tpu.memory_space<vmem>>, vector<4x32xf32>
    tpu.vector_store %arg9[%c20, %c32_22], %80 {strides = array<i32>} : memref<32x64xf32, #tpu.memory_space<vmem>>, vector<4x32xf32>,
    %82 = vector.extract_strided_slice %5 {offsets = [12, 0], sizes = [4, 256], strides = [1, 1]} : vector<32x256xf32> to vector<4x256xf32>
    %cst_23 = arith.constant dense<0.000000e+00> : vector<4x256xf32>
    %83 = tpu.matmul %77, %6, %cst_23 {dimension_numbers = #tpu.dot_dimension_numbers<[1], [0], [0], [1], [0, 0, 1, 1], [], []>} : vector<4x64xf32>, vector<64x256xf32>, vector<4x256xf32> -> vector<4x256xf32>
    %84 = arith.addf %82, %83 : vector<4x256xf32>
    %85 = arith.negf %84 : vector<4x256xf32>
    %86 = math.exp %85 : vector<4x256xf32>
    %cst_24 = arith.constant 1.000000e+00 : f32
    %87 = vector.broadcast %cst_24 : f32 to vector<4x256xf32>
    %88 = arith.addf %87, %86 : vector<4x256xf32>
    %89 = arith.divf %87, %88 : vector<4x256xf32>
    %90 = vector.extract_strided_slice %89 {offsets = [0, 0], sizes = [4, 64], strides = [1, 1]} : vector<4x256xf32> to vector<4x64xf32>
    %91 = vector.extract_strided_slice %89 {offsets = [0, 64], sizes = [4, 64], strides = [1, 1]} : vector<4x256xf32> to vector<4x64xf32>
    %92 = vector.extract_strided_slice %89 {offsets = [0, 192], sizes = [4, 64], strides = [1, 1]} : vector<4x256xf32> to vector<4x64xf32>
    %93 = vector.extract_strided_slice %84 {offsets = [0, 128], sizes = [4, 64], strides = [1, 1]} : vector<4x256xf32> to vector<4x64xf32>
    %94 = math.tanh %93 : vector<4x64xf32>
    %95 = vector.extract_strided_slice %7 {offsets = [12, 0], sizes = [4, 64], strides = [1, 1]} : vector<32x64xf32> to vector<4x64xf32>
    %96 = arith.mulf %91, %75 : vector<4x64xf32>
    %97 = arith.mulf %90, %94 : vector<4x64xf32>
    %98 = arith.addf %96, %97 : vector<4x64xf32>
    %99 = arith.mulf %98, %95 : vector<4x64xf32>
    %100 = math.tanh %99 : vector<4x64xf32>
    %101 = arith.mulf %92, %100 : vector<4x64xf32>
    %102 = vector.extract_strided_slice %101 {offsets = [0, 0], sizes = [4, 32], strides = [1, 1]} : vector<4x64xf32> to vector<4x32xf32>
    %c12 = arith.constant 12 : index
    %c0_25 = arith.constant 0 : index
    %103 = vector.load %arg9[%c12, %c0_25] : memref<32x64xf32, #tpu.memory_space<vmem>>, vector<4x32xf32>
    tpu.vector_store %arg9[%c12, %c0_25], %102 {strides = array<i32>} : memref<32x64xf32, #tpu.memory_space<vmem>>, vector<4x32xf32>,
    %104 = vector.extract_strided_slice %101 {offsets = [0, 32], sizes = [4, 32], strides = [1, 1]} : vector<4x64xf32> to vector<4x32xf32>
    %c16 = arith.constant 16 : index
    %c32_26 = arith.constant 32 : index
    %105 = vector.load %arg9[%c16, %c32_26] : memref<32x64xf32, #tpu.memory_space<vmem>>, vector<4x32xf32>
    tpu.vector_store %arg9[%c16, %c32_26], %104 {strides = array<i32>} : memref<32x64xf32, #tpu.memory_space<vmem>>, vector<4x32xf32>,
    %106 = vector.extract_strided_slice %5 {offsets = [16, 0], sizes = [4, 256], strides = [1, 1]} : vector<32x256xf32> to vector<4x256xf32>
    %cst_27 = arith.constant dense<0.000000e+00> : vector<4x256xf32>
    %107 = tpu.matmul %101, %6, %cst_27 {dimension_numbers = #tpu.dot_dimension_numbers<[1], [0], [0], [1], [0, 0, 1, 1], [], []>} : vector<4x64xf32>, vector<64x256xf32>, vector<4x256xf32> -> vector<4x256xf32>
    %108 = arith.addf %106, %107 : vector<4x256xf32>
    %109 = arith.negf %108 : vector<4x256xf32>
    %110 = math.exp %109 : vector<4x256xf32>
    %cst_28 = arith.constant 1.000000e+00 : f32
    %111 = vector.broadcast %cst_28 : f32 to vector<4x256xf32>
    %112 = arith.addf %111, %110 : vector<4x256xf32>
    %113 = arith.divf %111, %112 : vector<4x256xf32>
    %114 = vector.extract_strided_slice %113 {offsets = [0, 0], sizes = [4, 64], strides = [1, 1]} : vector<4x256xf32> to vector<4x64xf32>
    %115 = vector.extract_strided_slice %113 {offsets = [0, 64], sizes = [4, 64], strides = [1, 1]} : vector<4x256xf32> to vector<4x64xf32>
    %116 = vector.extract_strided_slice %113 {offsets = [0, 192], sizes = [4, 64], strides = [1, 1]} : vector<4x256xf32> to vector<4x64xf32>
    %117 = vector.extract_strided_slice %108 {offsets = [0, 128], sizes = [4, 64], strides = [1, 1]} : vector<4x256xf32> to vector<4x64xf32>
    %118 = math.tanh %117 : vector<4x64xf32>
    %119 = vector.extract_strided_slice %7 {offsets = [16, 0], sizes = [4, 64], strides = [1, 1]} : vector<32x64xf32> to vector<4x64xf32>
    %120 = arith.mulf %115, %99 : vector<4x64xf32>
    %121 = arith.mulf %114, %118 : vector<4x64xf32>
    %122 = arith.addf %120, %121 : vector<4x64xf32>
    %123 = arith.mulf %122, %119 : vector<4x64xf32>
    %124 = math.tanh %123 : vector<4x64xf32>
    %125 = arith.mulf %116, %124 : vector<4x64xf32>
    %126 = vector.extract_strided_slice %125 {offsets = [0, 0], sizes = [4, 32], strides = [1, 1]} : vector<4x64xf32> to vector<4x32xf32>
    %c16_29 = arith.constant 16 : index
    %c0_30 = arith.constant 0 : index
    %127 = vector.load %arg9[%c16_29, %c0_30] : memref<32x64xf32, #tpu.memory_space<vmem>>, vector<4x32xf32>
    tpu.vector_store %arg9[%c16_29, %c0_30], %126 {strides = array<i32>} : memref<32x64xf32, #tpu.memory_space<vmem>>, vector<4x32xf32>,
    %128 = vector.extract_strided_slice %125 {offsets = [0, 32], sizes = [4, 32], strides = [1, 1]} : vector<4x64xf32> to vector<4x32xf32>
    %c12_31 = arith.constant 12 : index
    %c32_32 = arith.constant 32 : index
    %129 = vector.load %arg9[%c12_31, %c32_32] : memref<32x64xf32, #tpu.memory_space<vmem>>, vector<4x32xf32>
    tpu.vector_store %arg9[%c12_31, %c32_32], %128 {strides = array<i32>} : memref<32x64xf32, #tpu.memory_space<vmem>>, vector<4x32xf32>,
    %130 = vector.extract_strided_slice %5 {offsets = [20, 0], sizes = [4, 256], strides = [1, 1]} : vector<32x256xf32> to vector<4x256xf32>
    %cst_33 = arith.constant dense<0.000000e+00> : vector<4x256xf32>
    %131 = tpu.matmul %125, %6, %cst_33 {dimension_numbers = #tpu.dot_dimension_numbers<[1], [0], [0], [1], [0, 0, 1, 1], [], []>} : vector<4x64xf32>, vector<64x256xf32>, vector<4x256xf32> -> vector<4x256xf32>
    %132 = arith.addf %130, %131 : vector<4x256xf32>
    %133 = arith.negf %132 : vector<4x256xf32>
    %134 = math.exp %133 : vector<4x256xf32>
    %cst_34 = arith.constant 1.000000e+00 : f32
    %135 = vector.broadcast %cst_34 : f32 to vector<4x256xf32>
    %136 = arith.addf %135, %134 : vector<4x256xf32>
    %137 = arith.divf %135, %136 : vector<4x256xf32>
    %138 = vector.extract_strided_slice %137 {offsets = [0, 0], sizes = [4, 64], strides = [1, 1]} : vector<4x256xf32> to vector<4x64xf32>
    %139 = vector.extract_strided_slice %137 {offsets = [0, 64], sizes = [4, 64], strides = [1, 1]} : vector<4x256xf32> to vector<4x64xf32>
    %140 = vector.extract_strided_slice %137 {offsets = [0, 192], sizes = [4, 64], strides = [1, 1]} : vector<4x256xf32> to vector<4x64xf32>
    %141 = vector.extract_strided_slice %132 {offsets = [0, 128], sizes = [4, 64], strides = [1, 1]} : vector<4x256xf32> to vector<4x64xf32>
    %142 = math.tanh %141 : vector<4x64xf32>
    %143 = vector.extract_strided_slice %7 {offsets = [20, 0], sizes = [4, 64], strides = [1, 1]} : vector<32x64xf32> to vector<4x64xf32>
    %144 = arith.mulf %139, %123 : vector<4x64xf32>
    %145 = arith.mulf %138, %142 : vector<4x64xf32>
    %146 = arith.addf %144, %145 : vector<4x64xf32>
    %147 = arith.mulf %146, %143 : vector<4x64xf32>
    %148 = math.tanh %147 : vector<4x64xf32>
    %149 = arith.mulf %140, %148 : vector<4x64xf32>
    %150 = vector.extract_strided_slice %149 {offsets = [0, 0], sizes = [4, 32], strides = [1, 1]} : vector<4x64xf32> to vector<4x32xf32>
    %c20_35 = arith.constant 20 : index
    %c0_36 = arith.constant 0 : index
    %151 = vector.load %arg9[%c20_35, %c0_36] : memref<32x64xf32, #tpu.memory_space<vmem>>, vector<4x32xf32>
    tpu.vector_store %arg9[%c20_35, %c0_36], %150 {strides = array<i32>} : memref<32x64xf32, #tpu.memory_space<vmem>>, vector<4x32xf32>,
    %152 = vector.extract_strided_slice %149 {offsets = [0, 32], sizes = [4, 32], strides = [1, 1]} : vector<4x64xf32> to vector<4x32xf32>
    %c8_37 = arith.constant 8 : index
    %c32_38 = arith.constant 32 : index
    %153 = vector.load %arg9[%c8_37, %c32_38] : memref<32x64xf32, #tpu.memory_space<vmem>>, vector<4x32xf32>
    tpu.vector_store %arg9[%c8_37, %c32_38], %152 {strides = array<i32>} : memref<32x64xf32, #tpu.memory_space<vmem>>, vector<4x32xf32>,
    %154 = vector.extract_strided_slice %5 {offsets = [24, 0], sizes = [4, 256], strides = [1, 1]} : vector<32x256xf32> to vector<4x256xf32>
    %cst_39 = arith.constant dense<0.000000e+00> : vector<4x256xf32>
    %155 = tpu.matmul %149, %6, %cst_39 {dimension_numbers = #tpu.dot_dimension_numbers<[1], [0], [0], [1], [0, 0, 1, 1], [], []>} : vector<4x64xf32>, vector<64x256xf32>, vector<4x256xf32> -> vector<4x256xf32>
    %156 = arith.addf %154, %155 : vector<4x256xf32>
    %157 = arith.negf %156 : vector<4x256xf32>
    %158 = math.exp %157 : vector<4x256xf32>
    %cst_40 = arith.constant 1.000000e+00 : f32
    %159 = vector.broadcast %cst_40 : f32 to vector<4x256xf32>
    %160 = arith.addf %159, %158 : vector<4x256xf32>
    %161 = arith.divf %159, %160 : vector<4x256xf32>
    %162 = vector.extract_strided_slice %161 {offsets = [0, 0], sizes = [4, 64], strides = [1, 1]} : vector<4x256xf32> to vector<4x64xf32>
    %163 = vector.extract_strided_slice %161 {offsets = [0, 64], sizes = [4, 64], strides = [1, 1]} : vector<4x256xf32> to vector<4x64xf32>
    %164 = vector.extract_strided_slice %161 {offsets = [0, 192], sizes = [4, 64], strides = [1, 1]} : vector<4x256xf32> to vector<4x64xf32>
    %165 = vector.extract_strided_slice %156 {offsets = [0, 128], sizes = [4, 64], strides = [1, 1]} : vector<4x256xf32> to vector<4x64xf32>
    %166 = math.tanh %165 : vector<4x64xf32>
    %167 = vector.extract_strided_slice %7 {offsets = [24, 0], sizes = [4, 64], strides = [1, 1]} : vector<32x64xf32> to vector<4x64xf32>
    %168 = arith.mulf %163, %147 : vector<4x64xf32>
    %169 = arith.mulf %162, %166 : vector<4x64xf32>
    %170 = arith.addf %168, %169 : vector<4x64xf32>
    %171 = arith.mulf %170, %167 : vector<4x64xf32>
    %172 = math.tanh %171 : vector<4x64xf32>
    %173 = arith.mulf %164, %172 : vector<4x64xf32>
    %174 = vector.extract_strided_slice %173 {offsets = [0, 0], sizes = [4, 32], strides = [1, 1]} : vector<4x64xf32> to vector<4x32xf32>
    %c24_41 = arith.constant 24 : index
    %c0_42 = arith.constant 0 : index
    %175 = vector.load %arg9[%c24_41, %c0_42] : memref<32x64xf32, #tpu.memory_space<vmem>>, vector<4x32xf32>
    tpu.vector_store %arg9[%c24_41, %c0_42], %174 {strides = array<i32>} : memref<32x64xf32, #tpu.memory_space<vmem>>, vector<4x32xf32>,
    %176 = vector.extract_strided_slice %173 {offsets = [0, 32], sizes = [4, 32], strides = [1, 1]} : vector<4x64xf32> to vector<4x32xf32>
    %c4_43 = arith.constant 4 : index
    %c32_44 = arith.constant 32 : index
    %177 = vector.load %arg9[%c4_43, %c32_44] : memref<32x64xf32, #tpu.memory_space<vmem>>, vector<4x32xf32>
    tpu.vector_store %arg9[%c4_43, %c32_44], %176 {strides = array<i32>} : memref<32x64xf32, #tpu.memory_space<vmem>>, vector<4x32xf32>,
    %178 = vector.extract_strided_slice %5 {offsets = [28, 0], sizes = [4, 256], strides = [1, 1]} : vector<32x256xf32> to vector<4x256xf32>
    %cst_45 = arith.constant dense<0.000000e+00> : vector<4x256xf32>
    %179 = tpu.matmul %173, %6, %cst_45 {dimension_numbers = #tpu.dot_dimension_numbers<[1], [0], [0], [1], [0, 0, 1, 1], [], []>} : vector<4x64xf32>, vector<64x256xf32>, vector<4x256xf32> -> vector<4x256xf32>
    %180 = arith.addf %178, %179 : vector<4x256xf32>
    %181 = arith.negf %180 : vector<4x256xf32>
    %182 = math.exp %181 : vector<4x256xf32>
    %cst_46 = arith.constant 1.000000e+00 : f32
    %183 = vector.broadcast %cst_46 : f32 to vector<4x256xf32>
    %184 = arith.addf %183, %182 : vector<4x256xf32>
    %185 = arith.divf %183, %184 : vector<4x256xf32>
    %186 = vector.extract_strided_slice %185 {offsets = [0, 0], sizes = [4, 64], strides = [1, 1]} : vector<4x256xf32> to vector<4x64xf32>
    %187 = vector.extract_strided_slice %185 {offsets = [0, 64], sizes = [4, 64], strides = [1, 1]} : vector<4x256xf32> to vector<4x64xf32>
    %188 = vector.extract_strided_slice %185 {offsets = [0, 192], sizes = [4, 64], strides = [1, 1]} : vector<4x256xf32> to vector<4x64xf32>
    %189 = vector.extract_strided_slice %180 {offsets = [0, 128], sizes = [4, 64], strides = [1, 1]} : vector<4x256xf32> to vector<4x64xf32>
    %190 = math.tanh %189 : vector<4x64xf32>
    %191 = vector.extract_strided_slice %7 {offsets = [28, 0], sizes = [4, 64], strides = [1, 1]} : vector<32x64xf32> to vector<4x64xf32>
    %192 = arith.mulf %187, %171 : vector<4x64xf32>
    %193 = arith.mulf %186, %190 : vector<4x64xf32>
    %194 = arith.addf %192, %193 : vector<4x64xf32>
    %195 = arith.mulf %194, %191 : vector<4x64xf32>
    %196 = math.tanh %195 : vector<4x64xf32>
    %197 = arith.mulf %188, %196 : vector<4x64xf32>
    %198 = vector.extract_strided_slice %197 {offsets = [0, 0], sizes = [4, 32], strides = [1, 1]} : vector<4x64xf32> to vector<4x32xf32>
    %c28_47 = arith.constant 28 : index
    %c0_48 = arith.constant 0 : index
    %199 = vector.load %arg9[%c28_47, %c0_48] : memref<32x64xf32, #tpu.memory_space<vmem>>, vector<4x32xf32>
    tpu.vector_store %arg9[%c28_47, %c0_48], %198 {strides = array<i32>} : memref<32x64xf32, #tpu.memory_space<vmem>>, vector<4x32xf32>,
    %200 = vector.extract_strided_slice %197 {offsets = [0, 32], sizes = [4, 32], strides = [1, 1]} : vector<4x64xf32> to vector<4x32xf32>
    %c0_49 = arith.constant 0 : index
    %c32_50 = arith.constant 32 : index
    %201 = vector.load %arg9[%c0_49, %c32_50] : memref<32x64xf32, #tpu.memory_space<vmem>>, vector<4x32xf32>
    tpu.vector_store %arg9[%c0_49, %c32_50], %200 {strides = array<i32>} : memref<32x64xf32, #tpu.memory_space<vmem>>, vector<4x32xf32>,
    %c0_51 = arith.constant 0 : index
    %c0_52 = arith.constant 0 : index
    %202 = vector.load %arg7[%c0_51, %c0_52] : memref<32x32xf32, #tpu.memory_space<vmem>>, vector<32x32xf32>
    %c0_53 = arith.constant 0 : index
    %c0_54 = arith.constant 0 : index
    %203 = vector.load %arg9[%c0_53, %c0_54] : memref<32x64xf32, #tpu.memory_space<vmem>>, vector<32x64xf32>
    %cst_55 = arith.constant dense<0.000000e+00> : vector<32x64xf32>
    %204 = tpu.matmul %202, %203, %cst_55 {dimension_numbers = #tpu.dot_dimension_numbers<[1], [0], [0], [1], [0, 0, 1, 1], [], []>} : vector<32x32xf32>, vector<32x64xf32>, vector<32x64xf32> -> vector<32x64xf32>
    %c0_56 = arith.constant 0 : index
    %c0_57 = arith.constant 0 : index
    %205 = vector.load %arg5[%c0_56, %c0_57] : memref<64x10xf32, #tpu.memory_space<vmem>>, vector<64x10xf32>
    %cst_58 = arith.constant dense<0.000000e+00> : vector<32x10xf32>
    %206 = tpu.matmul %204, %205, %cst_58 {dimension_numbers = #tpu.dot_dimension_numbers<[1], [0], [0], [1], [0, 0, 1, 1], [], []>} : vector<32x64xf32>, vector<64x10xf32>, vector<32x10xf32> -> vector<32x10xf32>
    %c0_59 = arith.constant 0 : index
    %c0_60 = arith.constant 0 : index
    %207 = vector.load %arg6[%c0_59, %c0_60] : memref<1x10xf32, #tpu.memory_space<vmem>>, vector<1x10xf32>
    %208 = vector.broadcast %207 : vector<1x10xf32> to vector<32x10xf32>
    %209 = arith.addf %206, %208 : vector<32x10xf32>
    %cst_61 = arith.constant dense<0xFF800000> : vector<32xf32>
    %210 = vector.multi_reduction <maximumf>, %209, %cst_61 [1] : vector<32x10xf32> to vector<32xf32>
    %211 = vector.shape_cast %210 : vector<32xf32> to vector<32x1xf32>
    %212 = vector.broadcast %211 : vector<32x1xf32> to vector<32x10xf32>
    %213 = arith.subf %209, %212 : vector<32x10xf32>
    %214 = math.exp %213 : vector<32x10xf32>
    %cst_62 = arith.constant dense<0.000000e+00> : vector<32xf32>
    %215 = vector.multi_reduction <add>, %214, %cst_62 [1] : vector<32x10xf32> to vector<32xf32>
    %216 = vector.shape_cast %215 : vector<32xf32> to vector<32x1xf32>
    %217 = math.log %216 : vector<32x1xf32>
    %218 = vector.broadcast %217 : vector<32x1xf32> to vector<32x10xf32>
    %219 = arith.subf %213, %218 : vector<32x10xf32>
    %220 = vector.shape_cast %219 : vector<32x10xf32> to vector<4x8x10xf32>
    %c0_63 = arith.constant 0 : index
    %c0_64 = arith.constant 0 : index
    %c0_65 = arith.constant 0 : index
    %221 = vector.load %arg8[%c0_63, %c0_64, %c0_65] : memref<4x8x10xf32, #tpu.memory_space<vmem>>, vector<4x8x10xf32>
    tpu.vector_store %arg8[%c0_63, %c0_64, %c0_65], %220 {strides = array<i32>} : memref<4x8x10xf32, #tpu.memory_space<vmem>>, vector<4x8x10xf32>,
    return
  }
}

</mosaic_0001>

<bundles_post_ra>
// kernel: bilstm_pos_forward.1
= control target key start
LH: loop header
LB: loop body
LE: loop exit
PB: predicated region body
PF: predicated region fallthrough
CT: control target
= control target key end

     0   :  { %s2119_s0 = inlined_call_operand.vmem [shape: f32[32,64], index: 0, kind: input, shape index: {}]   ;;  %s2120_s1 = inlined_call_operand.vmem [shape: f32[64,256], index: 1, kind: input, shape index: {}]   ;;  %s2121_s2 = inlined_call_operand.vmem [shape: f32[1,256], index: 2, kind: input, shape index: {}]   ;;  %s2122_s3 = inlined_call_operand.vmem [shape: f32[64,256], index: 3, kind: input, shape index: {}]   ;;  %s2123_s4 = inlined_call_operand.vmem [shape: f32[32,64], index: 4, kind: input, shape index: {}]   ;;  %s2124_s5 = inlined_call_operand.vmem [shape: f32[64,10], index: 5, kind: input, shape index: {}]   ;;  %s2125_s6 = inlined_call_operand.vmem [shape: f32[1,10], index: 6, kind: input, shape index: {}]   ;;  %s2126_s7 = inlined_call_operand.vmem [shape: f32[32,32], index: 7, kind: input, shape index: {}]   ;;  %s2127_s8 = inlined_call_operand.hbm [shape: f32[4,8,10], index: 8, kind: output, shape index: {}]  }
   0x1   :  { %v49_v0 = vld [vmem:[%s2120_s1 + $0x78] sm:$0xff]  ;;  %v48_v2 = vld [vmem:[%s2120_s1 + $0x70] sm:$0xff]  ;;  %v47_v4 = vld [vmem:[%s2120_s1 + $0x68] sm:$0xff] }
   0x2   :  { %v1665_v1 = vld [vmem:[%s2122_s3 + $0x78] sm:$0xff]  ;;  %91 = vmatprep.subr.mxu0 %v49_v0  ;;  %v1674_v3 = vld [vmem:[%s2122_s3 + $0x70] sm:$0xff]  ;;  %v1682_v5 = vld [vmem:[%s2122_s3 + $0x68] sm:$0xff] }
   0x3   :  { %203 = vmatprep.subr.mxu1 %v1665_v1  ;;  %92 = vmatpush1.msra.mxu0 %v48_v2  ;;  %v46_v6 = vld [vmem:[%s2120_s1 + $0x60] sm:$0xff]  ;;  %v45_v8 = vld [vmem:[%s2120_s1 + $0x58] sm:$0xff]  ;;  %v44_v10 = vld [vmem:[%s2120_s1 + $0x50] sm:$0xff] }
   0x4   :  { %204 = vmatpush1.msra.mxu1 %v1674_v3  ;;  %v1691_v7 = vld [vmem:[%s2122_s3 + $0x60] sm:$0xff]  ;;  %93 = vmatprep.subr.mxu0 %v47_v4  ;;  %v1700_v9 = vld [vmem:[%s2122_s3 + $0x58] sm:$0xff]  ;;  %v1708_v11 = vld [vmem:[%s2122_s3 + $0x50] sm:$0xff] }
   0x5   :  { %205 = vmatprep.subr.mxu1 %v1682_v5  ;;  %94 = vmatpush1.msra.mxu0 %v46_v6  ;;  %v43_v12 = vld [vmem:[%s2120_s1 + $0x48] sm:$0xff]  ;;  %v42_v14 = vld [vmem:[%s2120_s1 + $0x40] sm:$0xff]  ;;  %v41_v16 = vld [vmem:[%s2120_s1 + $0x38] sm:$0xff] }
   0x6   :  { %206 = vmatpush1.msra.mxu1 %v1691_v7  ;;  %v1717_v13 = vld [vmem:[%s2122_s3 + $0x48] sm:$0xff]  ;;  %95 = vmatprep.subr.mxu0 %v45_v8  ;;  %v1726_v15 = vld [vmem:[%s2122_s3 + $0x40] sm:$0xff]  ;;  %v1735_v17 = vld [vmem:[%s2122_s3 + $0x38] sm:$0xff] }
   0x7   :  { %207 = vmatprep.subr.mxu1 %v1700_v9  ;;  %96 = vmatpush1.msra.mxu0 %v44_v10  ;;  %v40_v18 = vld [vmem:[%s2120_s1 + $0x30] sm:$0xff]  ;;  %v39_v20 = vld [vmem:[%s2120_s1 + $0x28] sm:$0xff]  ;;  %v38_v22 = vld [vmem:[%s2120_s1 + $0x20] sm:$0xff] }
   0x8   :  { %208 = vmatpush1.msra.mxu1 %v1708_v11  ;;  %97 = vmatprep.subr.mxu0 %v43_v12  ;;  %v1744_v19 = vld [vmem:[%s2122_s3 + $0x30] sm:$0xff]  ;;  %v1753_v21 = vld [vmem:[%s2122_s3 + $0x28] sm:$0xff]  ;;  %v1762_v23 = vld [vmem:[%s2122_s3 + $0x20] sm:$0xff] }
   0x9   :  { %209 = vmatprep.subr.mxu1 %v1717_v13  ;;  %98 = vmatpush1.msra.mxu0 %v42_v14  ;;  %v37_v24 = vld [vmem:[%s2120_s1 + $0x18] sm:$0xff]  ;;  %v36_v26 = vld [vmem:[%s2120_s1 + $0x10] sm:$0xff] }
   0xa   :  { %210 = vmatpush1.msra.mxu1 %v1726_v15  ;;  %99 = vmatprep.subr.mxu0 %v41_v16  ;;  %v1771_v25 = vld [vmem:[%s2122_s3 + $0x18] sm:$0xff]  ;;  %v1780_v27 = vld [vmem:[%s2122_s3 + $0x10] sm:$0xff] }
   0xb   :  { %211 = vmatprep.subr.mxu1 %v1735_v17  ;;  %100 = vmatpush1.msra.mxu0 %v40_v18 }
   0xc   :  { %212 = vmatpush1.msra.mxu1 %v1744_v19  ;;  %101 = vmatprep.subr.mxu0 %v39_v20 }
   0xd   :  { %213 = vmatprep.subr.mxu1 %v1753_v21 }
   0xe   :  { %13 = vsyncpa [#allocation4], 0  ;;  %102 = vmatpush1.msra.mxu0 %v38_v22  ;;  %214 = vmatpush1.msra.mxu1 %v1762_v23  ;;  %v35_v28 = vld [vmem:[%s2120_s1 + $0x8] sm:$0xff]  ;;  %v34_v30 = vld [vmem:[%s2120_s1] sm:$0xff]  ;;  %vm62_vm0 = vcmask 523264   ;;  %v1609_v33 = vmov 0.0   ;;  %v52_v34 = vlaneseq }
   0xf   :  { %v1789_v29 = vld [vmem:[%s2122_s3 + $0x8] sm:$0xff]  ;;  %103 = vmatprep.subr.mxu0 %v37_v24  ;;  %215 = vmatprep.subr.mxu1 %v1771_v25  ;;  %v1799_v31 = vld [vmem:[%s2122_s3] sm:$0xff]  ;;  %v32_v57 = vld [vmem:[%s2119_s0 + $0x10] sm:$0xff]  ;;  %vm291_vm1 = vcmask 257024   ;;  %vm293_vm2 = vcmask 519424   ;;  %vm406_vm3 = vcmask 261124  }
  0x10   :  { %104 = vmatpush1.msra.mxu0 %v36_v26  ;;  %216 = vmatpush1.msra.mxu1 %v1780_v27  ;;  %v30_v32 = vld [vmem:[%s2119_s0] sm:$0xff]  ;;  %v53_v35 = vshrl.u32 %v52_v34, 7  ;;  %v31_v56 = vld [vmem:[%s2119_s0 + $0x8] sm:$0xff]  ;;  %v33_v58 = vld [vmem:[%s2119_s0 + $0x18] sm:$0xff]  ;;  %vm408_vm4 = vcmask 523524   ;;  %vm1099_vm5 = vcmask 261120  }
  0x11   :  { %105 = vmatprep.subr.mxu0 %v35_v28  ;;  %217 = vmatprep.subr.mxu1 %v1789_v29  ;;  %v50_v37 = vld [vmem:[%s2121_s2] sm:$0x3]  ;;  %s1610_s2 = smov 64   ;;  %vm1309_vm6 = vcmask 80896  }
  0x12   :  { %106 = vmatpush1.msra.mxu0 %v34_v30  ;;  %139 = vmatprep.mubr.f32.mxu0 %v1609_v33  ;;  %v54_v36 = vsub.s32 0, %v53_v35  ;;  %v58_v44 = vsub.s32 1, %v53_v35  ;;  %v180_v55 = vld [vmem:[%s2123_s4] sm:$0xff] }
  0x13   :  { %218 = vmatpush1.msra.mxu1 %v1799_v31  ;;  %251 = vmatprep.mubr.f32.mxu1 %v1609_v33 }
  0x14   :  { %1378 = vmatmul.mubr.msk.f32.vlgmr.msra.gmra.mxu0 %vm62_vm0, %v30_v32  ;;  %252 = vmatmul.mubr.f32.vlgmr.msra.gmra.mxu1 %v1609_v33  ;;  %v1849_v38 = vrot.slane %v50_v37, %v54_v36  ;;  %v1855_v45 = vrot.slane %v50_v37, %v58_v44 }
  0x15   :  { %313 = vmatprep.subr.mxu0 %v1665_v1  ;;  %145 = vmatprep.mubr.f32.mxu0 %v1609_v33 }
  0x16   :  { %314 = vmatpush1.msra.mxu0 %v1674_v3  ;;  %431 = vmatprep.subr.mxu1 %v1665_v1 }
  0x17   :  { %315 = vmatprep.subr.mxu0 %v1682_v5  ;;  %432 = vmatpush1.msra.mxu1 %v1674_v3 }
  0x18   :  { %316 = vmatpush1.msra.mxu0 %v1691_v7  ;;  %433 = vmatprep.subr.mxu1 %v1682_v5 }
  0x19   :  { %317 = vmatprep.subr.mxu0 %v1700_v9  ;;  %434 = vmatpush1.msra.mxu1 %v1691_v7 }
  0x1a   :  { %318 = vmatpush1.msra.mxu0 %v1708_v11  ;;  %435 = vmatprep.subr.mxu1 %v1700_v9 }
  0x1b   :  { %319 = vmatprep.subr.mxu0 %v1717_v13  ;;  %436 = vmatpush1.msra.mxu1 %v1708_v11 }
  0x1c   :  { %320 = vmatpush1.msra.mxu0 %v1726_v15  ;;  %437 = vmatprep.subr.mxu1 %v1717_v13 }
  0x1d   :  { %321 = vmatprep.subr.mxu0 %v1735_v17  ;;  %438 = vmatpush1.msra.mxu1 %v1726_v15 }
  0x1e   :  { %322 = vmatpush1.msra.mxu0 %v1744_v19  ;;  %439 = vmatprep.subr.mxu1 %v1735_v17 }
  0x1f   :  { %323 = vmatprep.subr.mxu0 %v1753_v21  ;;  %440 = vmatpush1.msra.mxu1 %v1744_v19 }
  0x20   :  { %324 = vmatpush1.msra.mxu0 %v1762_v23  ;;  %441 = vmatprep.subr.mxu1 %v1753_v21 }
  0x21   :  { %325 = vmatprep.subr.mxu0 %v1771_v25  ;;  %442 = vmatpush1.msra.mxu1 %v1762_v23 }
  0x22   :  { %326 = vmatpush1.msra.mxu0 %v1780_v27  ;;  %443 = vmatprep.subr.mxu1 %v1771_v25 }
  0x23   :  { %327 = vmatprep.subr.mxu0 %v1789_v29  ;;  %444 = vmatpush1.msra.mxu1 %v1780_v27 }
  0x24   :  { %328 = vmatpush1.msra.mxu0 %v1799_v31  ;;  %445 = vmatprep.subr.mxu1 %v1789_v29 }
  0x25   :  { %446 = vmatpush1.msra.mxu1 %v1799_v31  ;;  %479 = vmatprep.mubr.f32.mxu1 %v1609_v33 }
  0x26   :  { %542 = vmatprep.subr.mxu0 %v1665_v1  ;;  %658 = vmatprep.subr.mxu1 %v1665_v1 }
  0x27   :  { %1379 = vmatmul.mubr.msk.f32.gmra.mxu0 %vm62_vm0, %v31_v56 }
  0x28   :  { %151 = vmatprep.mubr.f32.mxu0 %v1609_v33 }
  0x2b   :  { %1380 = vmatmul.mubr.msk.f32.gmra.mxu0 %vm62_vm0, %v32_v57  ;;  %v181_v57 = vld [vmem:[%s2123_s4 + $0x8] sm:$0xff] }
  0x2c   :  { %157 = vmatprep.mubr.f32.mxu0 %v1609_v33 }
  0x2f   :  { %1381 = vmatmul.mubr.msk.f32.gmra.mxu0 %vm62_vm0, %v33_v58 }
  0x30   :  { %361 = vmatprep.mubr.f32.mxu0 %v1609_v33 }
  0xd4   :  { %v141_v39 = vpop.f32.mrf.mxu0  ;;  %v253_v41 = vpop.f32.mrf.mxu1 }
  0xd5   :  { %v1852_v40 = vadd.f32 %v141_v39, %v1849_v38 }
  0xd6   :  { %v143_v46 = vpop.f32.mrf.mxu0  ;;  %v255_v48 = vpop.f32.mrf.mxu1 }
  0xd7   :  { %v258_v42 = vadd.f32 %v253_v41, %v1852_v40  ;;  %v1858_v47 = vadd.f32 %v143_v46, %v1855_v45 }
  0xd9   :  { %v1382_v43 = vmul.f32 -1.442695, %v258_v42  ;;  %v259_v49 = vadd.f32 %v255_v48, %v1858_v47 }
  0xdb   :  { %1475 = vpow2.f32 %v1382_v43  ;;  %v1383_v59 = vmul.f32 -1.442695, %v259_v49 }
  0xdc   :  { %1477 = vtanh.f32 %v259_v49 }
  0xe7   :  { %v147_v14 = vpop.f32.mrf.mxu0 }
  0xe8   :  { %v1476_v50 = vpop.eup %1475  ;;  %v148_v58 = vadd.f32 %v147_v14, %v1849_v38 }
  0xe9   :  { %v266_v51 = vadd.f32 1.0, %v1476_v50  ;;  %v1478_v52 = vpop.eup %1477  ;;  %v1902_v16 = vpop.f32.mrf.mxu0 }
  0xeb   :  { %1479 = vrcp.f32 %v266_v51  ;;  %v1904_v18 = vpop.f32.mrf.mxu0 }
  0xec   :  { %1481 = vpow2.f32 %v1383_v59 }
  0xed   :  { %v1906_v20 = vpop.f32.mrf.mxu0 }
  0xef   :  { %v1908_v22 = vpop.f32.mrf.mxu0 }
  0xf1   :  { %v1910_v24 = vpop.f32.mrf.mxu0 }
  0xf8   :  { %v1480_v53 = vpop.eup %1479 }
  0xf9   :  { %v274_v54 = vmul.f32 %v1480_v53, %v1478_v52  ;;  %v1482_v60 = vpop.eup %1481  ;;  %v273_v62 = vmul.f32 0.0, %v1480_v53 }
  0xfa   :  { %v267_v63 = vadd.f32 1.0, %v1482_v60 }
  0xfb   :  { %276 = vrot.lane.b32.xlu0 %v274_v54, %s1610_s2 }
  0xfc   :  { %1483 = vrcp.f32 %v267_v63  ;;  %v150_v63 = vadd.f32 %v1902_v16, %v1855_v45 }
  0xff   :  { %281 = vrot.lane.b32.xlu0 %v180_v55, %s1610_s2 }
 0x109   :  { %v1484_v6 = vpop.eup %1483 }
 0x16d   :  { %v277_v61 = vpop.permute.xlu0 %276 }
 0x16e   :  { %v279_v0 = vadd.f32 %v277_v61, %v273_v62 }
 0x171   :  { %v282_v2 = vpop.permute.xlu0 %281 }
 0x172   :  { %v284_v4 = vmul.f32 %v282_v2, %v279_v0 }
 0x174   :  { %1485 = vtanh.f32 %v284_v4  ;;  %v390_v42 = vrot.slane %v284_v4, 4 }
 0x181   :  { %v1486_v8 = vpop.eup %1485 }
 0x182   :  { %v286_v10 = vmul.f32 %v1486_v8, %v1484_v6 }
 0x184   :  { %288 = vrot.lane.b32.xlu1 %v286_v10, %s1610_s2 }
 0x1f6   :  { %v289_v12 = vpop.permute.xlu1 %288 }
 0x1f7   :  { %292 = vst.msk [vmem:[#allocation2] sm:$0xf] %vm291_vm1, %v289_v12  ;;  %1384 = vmatmul.mubr.msk.f32.vlgmr.msra.gmra.mxu0 %vm62_vm0, %v289_v12 }
 0x1f8   :  { %294 = vst.msk [vmem:[#allocation2 + $0x1c] sm:$0xf] %vm293_vm2, %v289_v12  ;;  %543 = vmatpush1.msra.mxu0 %v1674_v3  ;;  %590 = vmatprep.mubr.f32.mxu0 %v1609_v33 }
 0x1f9   :  { %544 = vmatprep.subr.mxu0 %v1682_v5 }
 0x1fa   :  { %545 = vmatpush1.msra.mxu0 %v1691_v7 }
 0x1fb   :  { %546 = vmatprep.subr.mxu0 %v1700_v9 }
 0x1fc   :  { %547 = vmatpush1.msra.mxu0 %v1708_v11 }
 0x1fd   :  { %548 = vmatprep.subr.mxu0 %v1717_v13 }
 0x1fe   :  { %549 = vmatpush1.msra.mxu0 %v1726_v15 }
 0x1ff   :  { %550 = vmatprep.subr.mxu0 %v1735_v17 }
 0x200   :  { %551 = vmatpush1.msra.mxu0 %v1744_v19 }
 0x201   :  { %552 = vmatprep.subr.mxu0 %v1753_v21 }
 0x202   :  { %553 = vmatpush1.msra.mxu0 %v1762_v23 }
 0x203   :  { %554 = vmatprep.subr.mxu0 %v1771_v25 }
 0x204   :  { %555 = vmatpush1.msra.mxu0 %v1780_v27 }
 0x205   :  { %556 = vmatprep.subr.mxu0 %v1789_v29 }
 0x206   :  { %557 = vmatpush1.msra.mxu0 %v1799_v31 }
 0x207   :  { %769 = vmatprep.subr.mxu0 %v1665_v1 }
 0x2b7   :  { %v363_v26 = vpop.f32.mrf.mxu0 }
 0x2b8   :  { %v370_v28 = vrot.slane %v363_v26, 4 }
 0x2b9   :  { %v365_v34 = vpop.f32.mrf.mxu0 }
 0x2ba   :  { %v374_v30 = vadd.f32 %v370_v28, %v1852_v40  ;;  %v371_v35 = vrot.slane %v365_v34, 4 }
 0x2bc   :  { %v1385_v32 = vmul.f32 -1.442695, %v374_v30  ;;  %v375_v36 = vadd.f32 %v371_v35, %v1858_v47 }
 0x2be   :  { %1487 = vpow2.f32 %v1385_v32  ;;  %v1386_v48 = vmul.f32 -1.442695, %v375_v36 }
 0x2bf   :  { %1489 = vtanh.f32 %v375_v36 }
 0x2cb   :  { %v1488_v37 = vpop.eup %1487 }
 0x2cc   :  { %v382_v39 = vadd.f32 1.0, %v1488_v37  ;;  %v1490_v41 = vpop.eup %1489 }
 0x2ce   :  { %1491 = vrcp.f32 %v382_v39 }
 0x2cf   :  { %1493 = vpow2.f32 %v1386_v48 }
 0x2db   :  { %v1492_v43 = vpop.eup %1491 }
 0x2dc   :  { %v393_v44 = vmul.f32 %v1492_v43, %v1490_v41  ;;  %v392_v46 = vmul.f32 %v1492_v43, %v390_v42  ;;  %v1494_v40 = vpop.eup %1493 }
 0x2dd   :  { %v383_v49 = vadd.f32 1.0, %v1494_v40 }
 0x2de   :  { %395 = vrot.lane.b32.xlu1 %v393_v44, %s1610_s2 }
 0x2df   :  { %1495 = vrcp.f32 %v383_v49 }
 0x2ec   :  { %v1496_v47 = vpop.eup %1495 }
 0x350   :  { %v396_v50 = vpop.permute.xlu1 %395 }
 0x351   :  { %v398_v51 = vadd.f32 %v396_v50, %v392_v46 }
 0x353   :  { %v399_v52 = vmul.f32 %v398_v51, %v282_v2 }
 0x355   :  { %1497 = vtanh.f32 %v399_v52  ;;  %v502_v8 = vrot.slane %v399_v52, 4 }
 0x362   :  { %v1498_v53 = vpop.eup %1497 }
 0x363   :  { %v1915_v54 = vmul.f32 %v1498_v53, %v1496_v47 }
 0x365   :  { %v410_v55 = vrot.slane %v1915_v54, 4 }
 0x367   :  { %411 = vrot.lane.b32.xlu0 %v410_v55, %s1610_s2 }
 0x36b   :  { %512 = vrot.lane.b32.xlu0 %v181_v57, %s1610_s2 }
 0x3d9   :  { %v412_v56 = vpop.permute.xlu0 %411 }
 0x3da   :  { %1387 = vmatmul.mubr.msk.f32.vlgmr.msra.gmra.mxu1 %vm62_vm0, %v412_v56 }
 0x3db   :  { %659 = vmatpush1.msra.mxu1 %v1674_v3  ;;  %706 = vmatprep.mubr.f32.mxu1 %v1609_v33 }
 0x3dc   :  { %660 = vmatprep.subr.mxu1 %v1682_v5 }
 0x3dd   :  { %661 = vmatpush1.msra.mxu1 %v1691_v7  ;;  %v513_v34 = vpop.permute.xlu0 %512 }
 0x3de   :  { %662 = vmatprep.subr.mxu1 %v1700_v9 }
 0x3df   :  { %663 = vmatpush1.msra.mxu1 %v1708_v11 }
 0x3e0   :  { %664 = vmatprep.subr.mxu1 %v1717_v13 }
 0x3e1   :  { %665 = vmatpush1.msra.mxu1 %v1726_v15 }
 0x3e2   :  { %666 = vmatprep.subr.mxu1 %v1735_v17 }
 0x3e3   :  { %667 = vmatpush1.msra.mxu1 %v1744_v19 }
 0x3e4   :  { %668 = vmatprep.subr.mxu1 %v1753_v21 }
 0x3e5   :  { %669 = vmatpush1.msra.mxu1 %v1762_v23 }
 0x3e6   :  { %670 = vmatprep.subr.mxu1 %v1771_v25 }
 0x3e7   :  { %671 = vmatpush1.msra.mxu1 %v1780_v27 }
 0x3e8   :  { %672 = vmatprep.subr.mxu1 %v1789_v29 }
 0x3e9   :  { %673 = vmatpush1.msra.mxu1 %v1799_v31 }
 0x3ea   :  { %885 = vmatprep.subr.mxu1 %v1665_v1 }
 0x49a   :  { %v481_v59 = vpop.f32.mrf.mxu1 }
 0x49b   :  { %v486_v60 = vadd.f32 %v481_v59, %v148_v58 }
 0x49c   :  { %v483_v62 = vpop.f32.mrf.mxu1 }
 0x49d   :  { %v1388_v61 = vmul.f32 -1.442695, %v486_v60  ;;  %v487_v0 = vadd.f32 %v483_v62, %v150_v63 }
 0x49f   :  { %1499 = vpow2.f32 %v1388_v61  ;;  %v1389_v14 = vmul.f32 -1.442695, %v487_v0 }
 0x4a0   :  { %1501 = vtanh.f32 %v487_v0 }
 0x4ac   :  { %v1500_v2 = vpop.eup %1499 }
 0x4ad   :  { %v494_v4 = vadd.f32 1.0, %v1500_v2  ;;  %v1502_v6 = vpop.eup %1501 }
 0x4af   :  { %1503 = vrcp.f32 %v494_v4 }
 0x4b0   :  { %1505 = vpow2.f32 %v1389_v14 }
 0x4bc   :  { %v1504_v10 = vpop.eup %1503 }
 0x4bd   :  { %v505_v12 = vmul.f32 %v1504_v10, %v1502_v6  ;;  %v504_v26 = vmul.f32 %v1504_v10, %v502_v8  ;;  %v1506_v28 = vpop.eup %1505  ;;  %v182_v6 = vld [vmem:[%s2123_s4 + $0x10] sm:$0xff]  ;;  %v154_v8 = vadd.f32 %v1904_v18, %v1849_v38 }
 0x4be   :  { %v495_v30 = vadd.f32 1.0, %v1506_v28  ;;  %v156_v28 = vadd.f32 %v1906_v20, %v1855_v45 }
 0x4bf   :  { %507 = vrot.lane.b32.xlu1 %v505_v12, %s1610_s2 }
 0x4c0   :  { %1507 = vrcp.f32 %v495_v30 }
 0x4cd   :  { %v1508_v36 = vpop.eup %1507 }
 0x531   :  { %v508_v32 = vpop.permute.xlu1 %507 }
 0x532   :  { %v510_v35 = vadd.f32 %v508_v32, %v504_v26 }
 0x534   :  { %v515_v16 = vmul.f32 %v513_v34, %v510_v35 }
 0x536   :  { %1509 = vtanh.f32 %v515_v16  ;;  %v619_v47 = vrot.slane %v515_v16, 4 }
 0x543   :  { %v1510_v37 = vpop.eup %1509 }
 0x544   :  { %v517_v39 = vmul.f32 %v1510_v37, %v1508_v36 }
 0x546   :  { %519 = vrot.lane.b32.xlu1 %v517_v39, %s1610_s2 }
 0x5b8   :  { %v520_v41 = vpop.permute.xlu1 %519 }
 0x5b9   :  { %522 = vst.msk [vmem:[#allocation2 + $0x8] sm:$0xf] %vm291_vm1, %v520_v41  ;;  %1390 = vmatmul.mubr.msk.f32.vlgmr.msra.gmra.mxu0 %vm62_vm0, %v520_v41 }
 0x5ba   :  { %523 = vst.msk [vmem:[#allocation2 + $0x14] sm:$0xf] %vm293_vm2, %v520_v41  ;;  %770 = vmatpush1.msra.mxu0 %v1674_v3  ;;  %817 = vmatprep.mubr.f32.mxu0 %v1609_v33 }
 0x5bb   :  { %771 = vmatprep.subr.mxu0 %v1682_v5 }
 0x5bc   :  { %772 = vmatpush1.msra.mxu0 %v1691_v7 }
 0x5bd   :  { %773 = vmatprep.subr.mxu0 %v1700_v9 }
 0x5be   :  { %774 = vmatpush1.msra.mxu0 %v1708_v11 }
 0x5bf   :  { %775 = vmatprep.subr.mxu0 %v1717_v13 }
 0x5c0   :  { %776 = vmatpush1.msra.mxu0 %v1726_v15 }
 0x5c1   :  { %777 = vmatprep.subr.mxu0 %v1735_v17 }
 0x5c2   :  { %778 = vmatpush1.msra.mxu0 %v1744_v19 }
 0x5c3   :  { %779 = vmatprep.subr.mxu0 %v1753_v21 }
 0x5c4   :  { %780 = vmatpush1.msra.mxu0 %v1762_v23 }
 0x5c5   :  { %781 = vmatprep.subr.mxu0 %v1771_v25 }
 0x5c6   :  { %782 = vmatpush1.msra.mxu0 %v1780_v27 }
 0x5c7   :  { %783 = vmatprep.subr.mxu0 %v1789_v29 }
 0x5c8   :  { %784 = vmatpush1.msra.mxu0 %v1799_v31 }
 0x5c9   :  { %996 = vmatprep.subr.mxu0 %v1665_v1 }
 0x679   :  { %v592_v42 = vpop.f32.mrf.mxu0 }
 0x67a   :  { %v599_v43 = vrot.slane %v592_v42, 4 }
 0x67b   :  { %v594_v48 = vpop.f32.mrf.mxu0 }
 0x67c   :  { %v603_v44 = vadd.f32 %v599_v43, %v148_v58  ;;  %v600_v40 = vrot.slane %v594_v48, 4 }
 0x67e   :  { %v1391_v46 = vmul.f32 -1.442695, %v603_v44  ;;  %v604_v49 = vadd.f32 %v600_v40, %v150_v63 }
 0x680   :  { %1511 = vpow2.f32 %v1391_v46  ;;  %v1392_v1 = vmul.f32 -1.442695, %v604_v49 }
 0x681   :  { %1513 = vtanh.f32 %v604_v49 }
 0x68d   :  { %v1512_v50 = vpop.eup %1511 }
 0x68e   :  { %v611_v51 = vadd.f32 1.0, %v1512_v50  ;;  %v1514_v52 = vpop.eup %1513 }
 0x690   :  { %1515 = vrcp.f32 %v611_v51 }
 0x691   :  { %1517 = vpow2.f32 %v1392_v1 }
 0x69d   :  { %v1516_v53 = vpop.eup %1515 }
 0x69e   :  { %v622_v55 = vmul.f32 %v1516_v53, %v1514_v52  ;;  %v621_v56 = vmul.f32 %v1516_v53, %v619_v47  ;;  %v1518_v57 = vpop.eup %1517 }
 0x69f   :  { %v612_v58 = vadd.f32 1.0, %v1518_v57 }
 0x6a0   :  { %624 = vrot.lane.b32.xlu0 %v622_v55, %s1610_s2 }
 0x6a1   :  { %1519 = vrcp.f32 %v612_v58 }
 0x6ae   :  { %v1520_v62 = vpop.eup %1519 }
 0x712   :  { %v625_v59 = vpop.permute.xlu0 %624 }
 0x713   :  { %v627_v60 = vadd.f32 %v625_v59, %v621_v56  ;;  %v183_v59 = vld [vmem:[%s2123_s4 + $0x18] sm:$0xff] }
 0x715   :  { %v628_v61 = vmul.f32 %v627_v60, %v513_v34  ;;  %v160_v60 = vadd.f32 %v1908_v22, %v1849_v38 }
 0x717   :  { %1521 = vtanh.f32 %v628_v61  ;;  %v729_v16 = vrot.slane %v628_v61, 4 }
 0x724   :  { %v1522_v63 = vpop.eup %1521 }
 0x725   :  { %v1967_v0 = vmul.f32 %v1522_v63, %v1520_v62 }
 0x727   :  { %v637_v2 = vrot.slane %v1967_v0, 4 }
 0x729   :  { %638 = vrot.lane.b32.xlu1 %v637_v2, %s1610_s2 }
 0x72d   :  { %739 = vrot.lane.b32.xlu1 %v182_v6, %s1610_s2 }
 0x79b   :  { %v639_v4 = vpop.permute.xlu1 %638 }
 0x79c   :  { %1393 = vmatmul.mubr.msk.f32.vlgmr.msra.gmra.mxu1 %vm62_vm0, %v639_v4  ;;  %v162_v4 = vadd.f32 %v1910_v24, %v1855_v45 }
 0x79d   :  { %886 = vmatpush1.msra.mxu1 %v1674_v3  ;;  %933 = vmatprep.mubr.f32.mxu1 %v1609_v33 }
 0x79e   :  { %887 = vmatprep.subr.mxu1 %v1682_v5 }
 0x79f   :  { %888 = vmatpush1.msra.mxu1 %v1691_v7  ;;  %v740_v44 = vpop.permute.xlu1 %739 }
 0x7a0   :  { %889 = vmatprep.subr.mxu1 %v1700_v9 }
 0x7a1   :  { %890 = vmatpush1.msra.mxu1 %v1708_v11 }
 0x7a2   :  { %891 = vmatprep.subr.mxu1 %v1717_v13 }
 0x7a3   :  { %892 = vmatpush1.msra.mxu1 %v1726_v15 }
 0x7a4   :  { %893 = vmatprep.subr.mxu1 %v1735_v17 }
 0x7a5   :  { %894 = vmatpush1.msra.mxu1 %v1744_v19 }
 0x7a6   :  { %895 = vmatprep.subr.mxu1 %v1753_v21 }
 0x7a7   :  { %896 = vmatpush1.msra.mxu1 %v1762_v23 }
 0x7a8   :  { %897 = vmatprep.subr.mxu1 %v1771_v25 }
 0x7a9   :  { %898 = vmatpush1.msra.mxu1 %v1780_v27 }
 0x7aa   :  { %899 = vmatprep.subr.mxu1 %v1789_v29 }
 0x7ab   :  { %900 = vmatpush1.msra.mxu1 %v1799_v31 }
 0x85c   :  { %v708_v10 = vpop.f32.mrf.mxu1 }
 0x85d   :  { %v713_v12 = vadd.f32 %v708_v10, %v154_v8 }
 0x85e   :  { %v710_v14 = vpop.f32.mrf.mxu1 }
 0x85f   :  { %v1394_v26 = vmul.f32 -1.442695, %v713_v12  ;;  %v714_v30 = vadd.f32 %v710_v14, %v156_v28 }
 0x861   :  { %1523 = vpow2.f32 %v1394_v26  ;;  %v1395_v18 = vmul.f32 -1.442695, %v714_v30 }
 0x862   :  { %1525 = vtanh.f32 %v714_v30 }
 0x86e   :  { %v1524_v32 = vpop.eup %1523 }
 0x86f   :  { %v721_v34 = vadd.f32 1.0, %v1524_v32  ;;  %v1526_v35 = vpop.eup %1525 }
 0x871   :  { %1527 = vrcp.f32 %v721_v34 }
 0x872   :  { %1529 = vpow2.f32 %v1395_v18 }
 0x87e   :  { %v1528_v36 = vpop.eup %1527 }
 0x87f   :  { %v732_v37 = vmul.f32 %v1528_v36, %v1526_v35  ;;  %v731_v39 = vmul.f32 %v1528_v36, %v729_v16  ;;  %v1530_v41 = vpop.eup %1529 }
 0x880   :  { %v722_v42 = vadd.f32 1.0, %v1530_v41 }
 0x881   :  { %734 = vrot.lane.b32.xlu0 %v732_v37, %s1610_s2 }
 0x882   :  { %1531 = vrcp.f32 %v722_v42 }
 0x88f   :  { %v1532_v48 = vpop.eup %1531 }
 0x8f3   :  { %v735_v43 = vpop.permute.xlu0 %734 }
 0x8f4   :  { %v737_v46 = vadd.f32 %v735_v43, %v731_v39 }
 0x8f6   :  { %v742_v20 = vmul.f32 %v740_v44, %v737_v46 }
 0x8f8   :  { %1533 = vtanh.f32 %v742_v20 }
 0x905   :  { %v1534_v40 = vpop.eup %1533 }
 0x906   :  { %v744_v49 = vmul.f32 %v1534_v40, %v1532_v48 }
 0x908   :  { %746 = vrot.lane.b32.xlu0 %v744_v49, %s1610_s2 }
 0x97a   :  { %v1998_v50 = vpop.permute.xlu0 %746 }
 0x97b   :  { %1396 = vmatmul.mubr.msk.f32.vlgmr.msra.gmra.mxu0 %vm62_vm0, %v1998_v50 }
 0x97c   :  { %997 = vmatpush1.msra.mxu0 %v1674_v3  ;;  %1044 = vmatprep.mubr.f32.mxu0 %v1609_v33 }
 0x97d   :  { %998 = vmatprep.subr.mxu0 %v1682_v5 }
 0x97e   :  { %999 = vmatpush1.msra.mxu0 %v1691_v7 }
 0x97f   :  { %1000 = vmatprep.subr.mxu0 %v1700_v9 }
 0x980   :  { %1001 = vmatpush1.msra.mxu0 %v1708_v11 }
 0x981   :  { %1002 = vmatprep.subr.mxu0 %v1717_v13 }
 0x982   :  { %1003 = vmatpush1.msra.mxu0 %v1726_v15 }
 0x983   :  { %1004 = vmatprep.subr.mxu0 %v1735_v17 }
 0x984   :  { %1005 = vmatpush1.msra.mxu0 %v1744_v19 }
 0x985   :  { %1006 = vmatprep.subr.mxu0 %v1753_v21 }
 0x986   :  { %1007 = vmatpush1.msra.mxu0 %v1762_v23  ;;  %v846_v23 = vrot.slane %v742_v20, 4 }
 0x987   :  { %1008 = vmatprep.subr.mxu0 %v1771_v25 }
 0x988   :  { %1009 = vmatpush1.msra.mxu0 %v1780_v27 }
 0x989   :  { %1010 = vmatprep.subr.mxu0 %v1789_v29 }
 0x98a   :  { %1011 = vmatpush1.msra.mxu0 %v1799_v31 }
 0xa3b   :  { %v819_v3 = vpop.f32.mrf.mxu0 }
 0xa3c   :  { %v826_v5 = vrot.slane %v819_v3, 4 }
 0xa3d   :  { %v821_v11 = vpop.f32.mrf.mxu0 }
 0xa3e   :  { %v830_v7 = vadd.f32 %v826_v5, %v154_v8  ;;  %v827_v13 = vrot.slane %v821_v11, 4 }
 0xa40   :  { %v1397_v9 = vmul.f32 -1.442695, %v830_v7  ;;  %v831_v15 = vadd.f32 %v827_v13, %v156_v28 }
 0xa42   :  { %1535 = vpow2.f32 %v1397_v9  ;;  %v1398_v29 = vmul.f32 -1.442695, %v831_v15 }
 0xa43   :  { %1537 = vtanh.f32 %v831_v15 }
 0xa4f   :  { %v1536_v17 = vpop.eup %1535 }
 0xa50   :  { %v838_v19 = vadd.f32 1.0, %v1536_v17  ;;  %v1538_v21 = vpop.eup %1537 }
 0xa52   :  { %1539 = vrcp.f32 %v838_v19 }
 0xa53   :  { %1541 = vpow2.f32 %v1398_v29 }
 0xa5f   :  { %v1540_v25 = vpop.eup %1539 }
 0xa60   :  { %v849_v27 = vmul.f32 %v1540_v25, %v1538_v21  ;;  %v848_v33 = vmul.f32 %v1540_v25, %v846_v23  ;;  %v1542_v31 = vpop.eup %1541 }
 0xa61   :  { %v839_v51 = vadd.f32 1.0, %v1542_v31 }
 0xa62   :  { %851 = vrot.lane.b32.xlu1 %v849_v27, %s1610_s2  ;;  %v1091_v27 = vld [vmem:[%s2126_s7] sm:$0xff] }
 0xa63   :  { %1543 = vrcp.f32 %v839_v51 }
 0xa70   :  { %v1544_v55 = vpop.eup %1543 }
 0xad4   :  { %v852_v52 = vpop.permute.xlu1 %851 }
 0xad5   :  { %v854_v47 = vadd.f32 %v852_v52, %v848_v33 }
 0xad7   :  { %v855_v53 = vmul.f32 %v854_v47, %v740_v44 }
 0xad9   :  { %1545 = vtanh.f32 %v855_v53  ;;  %v956_v26 = vrot.slane %v855_v53, 4  ;;  %v1092_v53 = vld [vmem:[%s2126_s7 + $0x8] sm:$0xff] }
 0xae6   :  { %v1546_v56 = vpop.eup %1545 }
 0xae7   :  { %v2019_v1 = vmul.f32 %v1546_v56, %v1544_v55  ;;  %v1204_v55 = vld [vmem:[%s2124_s5 + $0x38] sm:$0xff]  ;;  %v1093_v56 = vld [vmem:[%s2126_s7 + $0x10] sm:$0xff] }
 0xae9   :  { %v864_v57 = vrot.slane %v2019_v1, 4 }
 0xaeb   :  { %865 = vrot.lane.b32.xlu0 %v864_v57, %s1610_s2  ;;  %v1094_v57 = vld [vmem:[%s2126_s7 + $0x18] sm:$0xff] }
 0xaef   :  { %966 = vrot.lane.b32.xlu0 %v183_v59, %s1610_s2  ;;  %v1201_v59 = vld [vmem:[%s2124_s5 + $0x20] sm:$0xff] }
 0xb5d   :  { %v866_v58 = vpop.permute.xlu0 %865 }
 0xb5e   :  { %1399 = vmatmul.mubr.msk.f32.vlgmr.msra.gmra.mxu1 %vm62_vm0, %v866_v58  ;;  %v1202_v58 = vld [vmem:[%s2124_s5 + $0x28] sm:$0xff] }
 0xb5f   :  { %1442 = vmatprep.mubr.msk.f32.mxu1 %vm1099_vm5, %v1091_v27 }
 0xb61   :  { %v967_v35 = vpop.permute.xlu0 %966 }
 0xc1e   :  { %v935_v61 = vpop.f32.mrf.mxu1 }
 0xc1f   :  { %v940_v62 = vadd.f32 %v935_v61, %v160_v60  ;;  %v1199_v61 = vld [vmem:[%s2124_s5 + $0x10] sm:$0xff] }
 0xc20   :  { %v937_v2 = vpop.f32.mrf.mxu1 }
 0xc21   :  { %v1400_v63 = vmul.f32 -1.442695, %v940_v62  ;;  %v941_v6 = vadd.f32 %v937_v2, %v162_v4  ;;  %v1198_v62 = vld [vmem:[%s2124_s5 + $0x8] sm:$0xff] }
 0xc23   :  { %1547 = vpow2.f32 %v1400_v63  ;;  %v1401_v38 = vmul.f32 -1.442695, %v941_v6  ;;  %v1197_v63 = vld [vmem:[%s2124_s5] sm:$0xff] }
 0xc24   :  { %1549 = vtanh.f32 %v941_v6 }
 0xc30   :  { %v1548_v8 = vpop.eup %1547 }
 0xc31   :  { %v948_v10 = vadd.f32 1.0, %v1548_v8  ;;  %v1550_v12 = vpop.eup %1549 }
 0xc33   :  { %1551 = vrcp.f32 %v948_v10  ;;  %v1409_v10 = vld [vmem:[%s2125_s6] ss:$0 sm:$0xff] }
 0xc34   :  { %1553 = vpow2.f32 %v1401_v38 }
 0xc40   :  { %v1552_v14 = vpop.eup %1551 }
 0xc41   :  { %v959_v28 = vmul.f32 %v1552_v14, %v1550_v12  ;;  %v958_v30 = vmul.f32 %v1552_v14, %v956_v26  ;;  %v1554_v22 = vpop.eup %1553 }
 0xc42   :  { %v949_v32 = vadd.f32 1.0, %v1554_v22 }
 0xc43   :  { %961 = vrot.lane.b32.xlu1 %v959_v28, %s1610_s2 }
 0xc44   :  { %1555 = vrcp.f32 %v949_v32 }
 0xc51   :  { %v1556_v24 = vpop.eup %1555 }
 0xcb5   :  { %v962_v34 = vpop.permute.xlu1 %961 }
 0xcb6   :  { %v964_v16 = vadd.f32 %v962_v34, %v958_v30 }
 0xcb8   :  { %v969_v45 = vmul.f32 %v967_v35, %v964_v16 }
 0xcba   :  { %1557 = vtanh.f32 %v969_v45  ;;  %v1073_v3 = vrot.slane %v969_v45, 4 }
 0xcc7   :  { %v1558_v36 = vpop.eup %1557 }
 0xcc8   :  { %v971_v37 = vmul.f32 %v1558_v36, %v1556_v24 }
 0xcca   :  { %973 = vrot.lane.b32.xlu1 %v971_v37, %s1610_s2 }
 0xcce   :  { %403 = vrot.lane.b32.xlu1 %v1915_v54, %s1610_s2 }
 0xcd2   :  { %632 = vrot.lane.b32.xlu1 %v1967_v0, %s1610_s2 }
 0xd3c   :  { %v974_v39 = vpop.permute.xlu1 %973 }
 0xd3d   :  { %1402 = vmatmul.mubr.msk.f32.vlgmr.msra.gmra.mxu0 %vm62_vm0, %v974_v39 }
 0xd40   :  { %v404_v18 = vpop.permute.xlu1 %403 }
 0xd41   :  { %407 = vst.msk [vmem:[#allocation2] sm:$0xf0] %vm406_vm3, %v404_v18 }
 0xd42   :  { %409 = vst.msk [vmem:[#allocation2 + $0x14] sm:$0xf0] %vm408_vm4, %v404_v18 }
 0xd43   :  { %976 = vst.msk [vmem:[#allocation2 + $0x18] sm:$0xf] %vm291_vm1, %v974_v39 }
 0xd44   :  { %977 = vst.msk [vmem:[#allocation2 + $0x4] sm:$0xf] %vm293_vm2, %v974_v39  ;;  %v633_v41 = vpop.permute.xlu1 %632 }
 0xd45   :  { %635 = vst.msk [vmem:[#allocation2 + $0x8] sm:$0xf0] %vm406_vm3, %v633_v41 }
 0xd46   :  { %636 = vst.msk [vmem:[#allocation2 + $0xc] sm:$0xf0] %vm408_vm4, %v633_v41 }
 0xd47   :  { %749 = vst.msk [vmem:[#allocation2 + $0x10] sm:$0xf] %vm291_vm1, %v1998_v50 }
 0xd48   :  { %750 = vst.msk [vmem:[#allocation2 + $0xc] sm:$0xf] %vm293_vm2, %v1998_v50 }
 0xdfd   :  { %v1046_v54 = vpop.f32.mrf.mxu0 }
 0xdfe   :  { %v1053_v0 = vrot.slane %v1046_v54, 4 }
 0xdff   :  { %v1048_v44 = vpop.f32.mrf.mxu0 }
 0xe00   :  { %v1057_v42 = vadd.f32 %v1053_v0, %v160_v60  ;;  %v1054_v46 = vrot.slane %v1048_v44, 4  ;;  %v1200_v60 = vld [vmem:[%s2124_s5 + $0x18] sm:$0xff] }
 0xe02   :  { %v1403_v43 = vmul.f32 -1.442695, %v1057_v42  ;;  %v1058_v20 = vadd.f32 %v1054_v46, %v162_v4 }
 0xe04   :  { %1559 = vpow2.f32 %v1403_v43  ;;  %v1404_v50 = vmul.f32 -1.442695, %v1058_v20 }
 0xe05   :  { %1561 = vtanh.f32 %v1058_v20 }
 0xe11   :  { %v1560_v48 = vpop.eup %1559 }
 0xe12   :  { %v1065_v40 = vadd.f32 1.0, %v1560_v48  ;;  %v1562_v49 = vpop.eup %1561 }
 0xe14   :  { %1563 = vrcp.f32 %v1065_v40 }
 0xe15   :  { %1565 = vpow2.f32 %v1404_v50 }
 0xe21   :  { %v1564_v5 = vpop.eup %1563 }
 0xe22   :  { %v1076_v7 = vmul.f32 %v1564_v5, %v1562_v49  ;;  %v1075_v9 = vmul.f32 %v1564_v5, %v1073_v3  ;;  %v1566_v11 = vpop.eup %1565 }
 0xe23   :  { %v1066_v13 = vadd.f32 1.0, %v1566_v11 }
 0xe24   :  { %1078 = vrot.lane.b32.xlu0 %v1076_v7, %s1610_s2 }
 0xe25   :  { %1567 = vrcp.f32 %v1066_v13 }
 0xe32   :  { %v1568_v21 = vpop.eup %1567 }
 0xe96   :  { %v1079_v15 = vpop.permute.xlu0 %1078 }
 0xe97   :  { %v1081_v17 = vadd.f32 %v1079_v15, %v1075_v9 }
 0xe99   :  { %v1082_v19 = vmul.f32 %v1081_v17, %v967_v35 }
 0xe9b   :  { %1569 = vtanh.f32 %v1082_v19 }
 0xea8   :  { %v1570_v23 = vpop.eup %1569 }
 0xea9   :  { %v1084_v25 = vmul.f32 %v1570_v23, %v1568_v21 }
 0xeab   :  { %1086 = vrot.lane.b32.xlu0 %v1084_v25, %s1610_s2 }
 0xeaf   :  { %859 = vrot.lane.b32.xlu0 %v2019_v1, %s1610_s2  ;;  %v1203_v1 = vld [vmem:[%s2124_s5 + $0x30] sm:$0xff]  ;;  %s1611_s5 = smov [#allocation3]  }
 0xeb0   :  { %s1367_s6 = sshll.u32 %s1611_s5, 4  ;;  %s1368_s6 = int_to_ptr.vmem [resolvable:$true] %s1367_s6 }
 0xeb1   :  { %s1587_s16 = scalar_lea.vmem %s1368_s6, 512  ;;  %p1592_p1 = scmp.lt.s32.totalorder %s1368_s6, %s1368_s6 }
 0xeb2   :  { %p1588_p0 = scmp.ne.s32.totalorder %s1368_s6, %s1587_s16  ;;  %p1593_p2 = scmp.lt.s32.totalorder %s1587_s16, %s1587_s16 }
 0xeb4   :  { %p1594_p3 = por %p1593_p2, %p1592_p1 }
 0xeb6   :  { %p1595_p4 = pnand %p1594_p3, %p1588_p0 }
 0xf1d   :  { %v1087_v33 = vpop.permute.xlu0 %1086 }
 0xf1e   :  { %1089 = vst.msk [vmem:[#allocation2 + $0x18] sm:$0xf0] %vm406_vm3, %v1087_v33 }
 0xf1f   :  { %1090 = vst.msk [vmem:[#allocation2 - $0x4] sm:$0xf0] %vm408_vm4, %v1087_v33 }
 0xf21   :  { %v860_v29 = vpop.permute.xlu0 %859 }
 0xf22   :  { %862 = vst.msk [vmem:[#allocation2 + $0x10] sm:$0xf0] %vm406_vm3, %v860_v29 }
 0xf23   :  { %863 = vst.msk [vmem:[#allocation2 + $0x4] sm:$0xf0] %vm408_vm4, %v860_v29 }
 0xf25   :  { %v1098_v31 = vld [vmem:[#allocation2 + $0x18] sm:$0xff] }
 0xf26   :  { %1434 = vmatprep.subr.mxu1 %v1098_v31  ;;  %v1095_v47 = vld [vmem:[#allocation2] sm:$0xff] }
 0xf27   :  { %1435 = vmatpush3.msra.mxu1 %v1098_v31 }
 0xf29   :  { %v1097_v51 = vld [vmem:[#allocation2 + $0x10] sm:$0xff] }
 0xf2a   :  { %1436 = vmatprep.subr.mxu1 %v1097_v51  ;;  %v1096_v52 = vld [vmem:[#allocation2 + $0x8] sm:$0xff] }
 0xf2b   :  { %1437 = vmatpush3.msra.mxu1 %v1097_v51 }
 0xf2c   :  { %1438 = vmatprep.subr.mxu1 %v1096_v52 }
 0xf2d   :  { %1439 = vmatpush3.msra.mxu1 %v1096_v52 }
 0xf2e   :  { %1440 = vmatprep.subr.mxu1 %v1095_v47 }
 0xf2f   :  { %1441 = vmatpush3.msra.mxu1 %v1095_v47 }
 0xf30   :  { %1443 = vmatmul.mubr.msk.f32.vlgmr.msra.gmra.mxu1 %vm1099_vm5, %v1092_v53  ;;  %1448 = vmatprep.subr.mxu1 %v1204_v55 }
 0xf31   :  { %1445 = vmatprep.mubr.msk.f32.mxu1 %vm1099_vm5, %v1093_v56  ;;  %1449 = vmatpush3.msra.mxu1 %v1204_v55 }
 0xf32   :  { %1450 = vmatprep.subr.mxu1 %v1203_v1 }
 0xf33   :  { %1451 = vmatpush3.msra.mxu1 %v1203_v1 }
 0xf34   :  { %1446 = vmatmul.mubr.msk.f32.gmra.mxu1 %vm1099_vm5, %v1094_v57  ;;  %1452 = vmatprep.subr.mxu1 %v1202_v58 }
 0xf35   :  { %1453 = vmatpush3.msra.mxu1 %v1202_v58 }
 0xf36   :  { %1454 = vmatprep.subr.mxu1 %v1201_v59 }
 0xf37   :  { %1455 = vmatpush3.msra.mxu1 %v1201_v59 }
 0xf38   :  { %1456 = vmatprep.subr.mxu1 %v1200_v60 }
 0xf39   :  { %1457 = vmatpush3.msra.mxu1 %v1200_v60 }
 0xf3a   :  { %1458 = vmatprep.subr.mxu1 %v1199_v61 }
 0xf3b   :  { %1459 = vmatpush3.msra.mxu1 %v1199_v61 }
 0xf3c   :  { %1460 = vmatprep.subr.mxu1 %v1198_v62 }
 0xf3d   :  { %1461 = vmatpush3.msra.mxu1 %v1198_v62 }
 0xf3e   :  { %1462 = vmatprep.subr.mxu1 %v1197_v63 }
 0xf3f   :  { %1463 = vmatpush3.msra.mxu1 %v1197_v63 }
 0xff0   :  { %v1444_v2 = vpop.f32.mrf.mxu1 }
 0xff2   :  { %v1178_v4 = vpop.f32.mrf.mxu1 }
 0xff3   :  { %1464 = vmatprep.mubr.msk.f32.mxu1 %vm62_vm0, %v1178_v4 }
 0xff4   :  { %v1447_v6 = vpop.f32.mrf.mxu1  ;;  %1465 = vmatmul.mubr.msk.f32.vlgmr.msra.gmra.mxu1 %vm62_vm0, %v1444_v2 }
 0xff6   :  { %v1188_v8 = vpop.f32.mrf.mxu1 }
 0xff7   :  { %1467 = vmatprep.mubr.msk.f32.mxu1 %vm62_vm0, %v1188_v8 }
 0xff8   :  { %1468 = vmatmul.mubr.msk.f32.gmra.mxu1 %vm62_vm0, %v1447_v6 }
0x10b4   :  { %v1466_v12 = vpop.f32.mrf.mxu1 }
0x10b5   :  { %v1296_v26 = vadd.f32 %v1466_v12, %v1409_v10 }
0x10b6   :  { %v1290_v14 = vpop.f32.mrf.mxu1 }
0x10b7   :  { %v1291_v28 = vadd.f32 %v1409_v10, %v1290_v14  ;;  %v1313_v30 = vsel %vm1309_vm6, %v1296_v26, -inf }
0x10b8   :  { %1314 = vmax.xlane.f32.xlu0 %v1313_v30  ;;  %v1469_v38 = vpop.f32.mrf.mxu1 }
0x10b9   :  { %v1306_v22 = vadd.f32 %v1469_v38, %v1409_v10  ;;  %v1310_v32 = vsel %vm1309_vm6, %v1291_v28, -inf }
0x10ba   :  { %v1300_v34 = vpop.f32.mrf.mxu1  ;;  %1311 = vmax.xlane.f32.xlu1 %v1310_v32 }
0x10bb   :  { %v1301_v35 = vadd.f32 %v1409_v10, %v1300_v34  ;;  %v1319_v45 = vsel %vm1309_vm6, %v1306_v22, -inf }
0x10bd   :  { %v1316_v16 = vsel %vm1309_vm6, %v1301_v35, -inf }
0x10be   :  { %1317 = vmax.xlane.f32.xlu0 %v1316_v16  ;;  %1320 = vmax.xlane.f32.xlu1 %v1319_v45 }
0x1141   :  { %v1315_v24 = vpop.xlane.xlu0 %1314 }
0x1142   :  { %v1323_v36 = vsub.f32 %v1296_v26, %v1315_v24 }
0x1143   :  { %v1312_v37 = vpop.xlane.xlu1 %1311 }
0x1144   :  { %v1328_v39 = vmul.f32 1.442695, %v1323_v36  ;;  %v1322_v18 = vsub.f32 %v1291_v28, %v1312_v37 }
0x1146   :  { %1571 = vpow2.f32 %v1328_v39  ;;  %v1326_v41 = vmul.f32 1.442695, %v1322_v18 }
0x1147   :  { %v1318_v54 = vpop.xlane.xlu0 %1317  ;;  %v1321_v0 = vpop.xlane.xlu1 %1320 }
0x1148   :  { %1573 = vpow2.f32 %v1326_v41  ;;  %v1324_v42 = vsub.f32 %v1301_v35, %v1318_v54  ;;  %v1325_v43 = vsub.f32 %v1306_v22, %v1321_v0 }
0x114a   :  { %v1330_v44 = vmul.f32 1.442695, %v1324_v42  ;;  %v1332_v46 = vmul.f32 1.442695, %v1325_v43 }
0x114c   :  { %1575 = vpow2.f32 %v1330_v44 }
0x114d   :  { %1577 = vpow2.f32 %v1332_v46 }
0x1153   :  { %v1572_v20 = vpop.eup %1571 }
0x1154   :  { %v1337_v48 = vsel %vm1309_vm6, %v1572_v20, 0.0 }
0x1155   :  { %v1574_v40 = vpop.eup %1573  ;;  %1338 = vadd.xlane.f32.xlu1 %v1337_v48 }
0x1156   :  { %v1334_v49 = vsel %vm1309_vm6, %v1574_v40, 0.0 }
0x1157   :  { %1335 = vadd.xlane.f32.xlu0 %v1334_v49 }
0x1159   :  { %v1576_v3 = vpop.eup %1575 }
0x115a   :  { %v1578_v5 = vpop.eup %1577  ;;  %v1340_v7 = vsel %vm1309_vm6, %v1576_v3, 0.0 }
0x115b   :  { %1341 = vadd.xlane.f32.xlu0 %v1340_v7  ;;  %v1343_v9 = vsel %vm1309_vm6, %v1578_v5, 0.0 }
0x115c   :  { %1344 = vadd.xlane.f32.xlu1 %v1343_v9 }
0x11de   :  { %v1339_v50 = vpop.xlane.xlu1 %1338 }
0x11df   :  { %1579 = vlog2.f32 %v1339_v50 }
0x11e0   :  { %v1336_v11 = vpop.xlane.xlu0 %1335 }
0x11e1   :  { %1581 = vlog2.f32 %v1336_v11 }
0x11e4   :  { %v1342_v13 = vpop.xlane.xlu0 %1341 }
0x11e5   :  { %1583 = vlog2.f32 %v1342_v13  ;;  %v1345_v15 = vpop.xlane.xlu1 %1344 }
0x11e6   :  { %1585 = vlog2.f32 %v1345_v15 }
0x11ec   :  { %v1580_v17 = vpop.eup %1579 }
0x11ed   :  { %v1349_v19 = vmul.f32 0.6931472, %v1580_v17 }
0x11ee   :  { %v1582_v21 = vpop.eup %1581 }
0x11ef   :  { %v1355_v23 = vsub.f32 %v1323_v36, %v1349_v19  ;;  %v1347_v25 = vmul.f32 0.6931472, %v1582_v21 }
0x11f1   :  { %1359 = vst.msk [vmem:[#allocation3 + $0x8] sm:$0xff] %vm1309_vm6, %v1355_v23  ;;  %v1354_v27 = vsub.f32 %v1322_v18, %v1347_v25 }
0x11f2   :  { %v1584_v33 = vpop.eup %1583 }
0x11f3   :  { %v1586_v29 = vpop.eup %1585  ;;  %1358 = vst.msk [vmem:[#allocation3] sm:$0xff] %vm1309_vm6, %v1354_v27  ;;  %v1351_v31 = vmul.f32 0.6931472, %v1584_v33 }
0x11f4   :  { %v1353_v51 = vmul.f32 0.6931472, %v1586_v29 }
0x11f5   :  { %v1356_v52 = vsub.f32 %v1324_v42, %v1351_v31 }
0x11f6   :  { %v1357_v47 = vsub.f32 %v1325_v43, %v1353_v51 }
0x11f7   :  { %1360 = vst.msk [vmem:[#allocation3 + $0x10] sm:$0xff] %vm1309_vm6, %v1356_v52 }
0x11f8   :  { %1361 = vst.msk [vmem:[#allocation3 + $0x18] sm:$0xff] %vm1309_vm6, %v1357_v47 }
0x11f9   :  { %1598 = shalt.err (!%p1595_p4)
}
0x11fa   :  { %s1612_s17 = smov 128   ;;  %s1613_s4 = smov 8  }
0x11fb   :  { %1373 = dma.vmem_to_hbm [thread:$0]  %s1368_s6, 512, %s2127_s8, [#allocation4], %s1612_s17, %s1612_s17, %s1613_s4  }
0x11fc   :  { %1607 = dma.done.wait [#allocation4], 512  }
0x11fd   :  { %1608 = vsyncadd [#allocation4], 4294966784 }
0x11fe   :  { %1377 = vsyncpa [#allocation4], 1 }

</bundles_post_ra>
